<compile_context>
chip_gen: v7x
topology: tpu7x:2x2x1
jax: 0.10.0
libtpu: 0.0.40
codegen_flags: <defaults>
</compile_context>

<pallas_src>
import functools
import math

import jax
import jax.numpy as jnp
from jax.experimental import pallas as pl
from jax.experimental.pallas import tpu as pltpu


KSIZES = (2, 3, 4)   # GlobalAttention conv kernel heights (cnn_1, cnn_2, cnn_3)


# ---------------------------------------------------------------------------
# Fused kernel: one grid step == one side (user or item)
# ---------------------------------------------------------------------------

def fused_vanra_kernel(x_ref,
                       latt_w, latt_b, lcnn_w, lcnn_b,          # LocalAttention scalars (SMEM)
                       gatt_w, gatt_b,                          # GlobalAttention gate
                       g1w, g1b, g2w, g2b, g3w, g3b,            # global conv weights (SMEM)
                       w1bd_ref, b1_ref, w2bd_ref, b2_ref,      # block-diag branch fcLayers
                       wt1_ref, bt1_ref, wt2_ref, bt2_ref,      # shared top fcLayer
                       out_ref,
                       xpad_s, slab_s,                          # VMEM scratch
                       *, L, win, CL, CG):
    sid = pl.program_id(0)                     # 0 = user, 1 = item
    x = x_ref[0]                               # (B, L)
    B = x.shape[0]
    pad = (win - 1) // 2

    # ---------------- LocalAttention ----------------
    # In-kernel zero padding (replaces the XLA-side jnp.pad / torch.cat).
    xpad_s[...] = jnp.zeros((B, L + 2 * pad), jnp.float32)
    xpad_s[:, pad:pad + L] = x
    xpad = xpad_s[...]                         # (B, L + win - 1)

    logits = jnp.zeros((B, L), jnp.float32)
    for k in range(win):                       # small static unroll (win taps)
        logits = logits + latt_w[sid, k] * xpad[:, k:k + L]
    logits = logits + latt_b[sid, 0]
    m = jnp.max(logits, axis=-1, keepdims=True)
    e = jnp.exp(logits - m)
    scores = e * pl.reciprocal(jnp.sum(e, axis=-1, keepdims=True), approx=True)
    s_loc = x * scores                         # attended input, (B, L)

    # ---------------- GlobalAttention gate (VPU reduce, no N=1 matmul) -------
    z = jnp.sum(x * gatt_w[0], axis=-1, keepdims=True) + gatt_b[sid, 0]   # (B, 1)
    gate = pl.reciprocal(1.0 + jnp.exp(-z), approx=True)                  # sigmoid
    s_glo = x * gate                           # (B, L)

    # ---------------- Channel slab: (B, (CL + 3*CG) * L) ---------------------
    # Every channel of every branch gets a lane-aligned, L-wide stripe; unused
    # tail lanes of the global stripes stay zero and are matched by zero rows
    # in the block-diagonal fc1 weight, so the result is exact.
    slab_s[...] = jnp.zeros((B, (CL + 3 * CG) * L), jnp.float32)

    # LocalAttention cnn: Conv2d(1, CL, (1,1)) + Tanh
    for c in range(CL):
        slab_s[:, c * L:(c + 1) * L] = jnp.tanh(lcnn_w[sid, c] * s_loc
                                                + lcnn_b[sid, c])

    # GlobalAttention cnn_k: Conv2d(1, CG, (k,1)) + Tanh, k = 2, 3, 4
    for i, (ksz, cw, cb) in enumerate(zip(KSIZES, (g1w, g2w, g3w),
                                          (g1b, g2b, g3b))):
        Lk = L - ksz + 1
        shifted = [s_glo[:, j:j + Lk] for j in range(ksz)]
        for c in range(CG):
            acc = jnp.zeros((B, Lk), jnp.float32)
            for j in range(ksz):
                acc = acc + cw[sid, c * ksz + j] * shifted[j]
            off = (CL + i * CG + c) * L
            slab_s[:, off:off + Lk] = jnp.tanh(acc + cb[sid, c])

    slab = slab_s[...]                         # (B, 256)

    # ---------------- Block-diagonal fcLayers of all 4 branches --------------
    hidden = jnp.dot(slab, w1bd_ref[0], preferred_element_type=jnp.float32) + b1_ref[0]
    hidden = jnp.maximum(hidden, 0.0)          # Dropout (eval) + ReLU
    cat = jnp.dot(hidden, w2bd_ref[0], preferred_element_type=jnp.float32) + b2_ref[0]
    # cat == concat([local, global_k2, global_k3, global_k4], -1): (B, 4*O)

    # ---------------- Shared top fcLayer -------------------------------------
    h = jnp.dot(cat, wt1_ref[...], preferred_element_type=jnp.float32) + bt1_ref[...]
    h = jnp.maximum(h, 0.0)
    out_ref[0] = (jnp.dot(h, wt2_ref[...], preferred_element_type=jnp.float32)
                  + bt2_ref[...])


# ---------------------------------------------------------------------------
# pallas_call wrapper
# ---------------------------------------------------------------------------

def vanra_vrl_forward(packed, x_user, x_item, *, L, win, CL, CG, H, O):
    B = x_user.shape[0]
    x = jnp.stack([x_user, x_item], axis=0)                 # (2, B, L)
    Kpad = (CL + 3 * CG) * L

    kern = functools.partial(fused_vanra_kernel, L=L, win=win, CL=CL, CG=CG)

    smem = pl.BlockSpec(memory_space=pltpu.MemorySpace.SMEM)
    vmem = pl.BlockSpec(memory_space=pltpu.MemorySpace.VMEM)

    def side(d1, d2):                                        # per-side blocked VMEM spec
        return pl.BlockSpec((1, d1, d2), lambda s: (s, 0, 0))

    out = pl.pallas_call(
        kern,
        out_shape=jax.ShapeDtypeStruct((2, B, O), jnp.float32),
        grid=(2,),                                           # user / item
        in_specs=[
            side(B, L),                                      # x (stacked)
            smem, smem, smem, smem,                          # local: att w/b, cnn w/b
            side(1, L), smem,                                # global gate: att w (VMEM), b
            smem, smem, smem, smem, smem, smem,              # global cnn w/b, k = 2,3,4
            side(Kpad, 4 * H), side(1, 4 * H),               # block-diag fc1 (per side)
            side(4 * H, 4 * O), side(1, 4 * O),              # block-diag fc2 (per side)
            vmem, vmem, vmem, vmem,                          # shared top fcLayer
        ],
        out_specs=side(B, O),
        scratch_shapes=[pltpu.VMEM((B, L + win - 1), jnp.float32),   # padded x
                        pltpu.VMEM((B, Kpad), jnp.float32)],         # feature slab
        compiler_params=pltpu.CompilerParams(
            dimension_semantics=("parallel",)),              # 2nd TensorCore on v7x
    )(x,
      packed["loc_att_w"], packed["loc_att_b"], packed["loc_cnn_w"], packed["loc_cnn_b"],
      packed["glob_att_w"], packed["glob_att_b"],
      packed["g_cnn_w0"], packed["g_cnn_b0"],
      packed["g_cnn_w1"], packed["g_cnn_b1"],
      packed["g_cnn_w2"], packed["g_cnn_b2"],
      packed["w1bd"], packed["b1"], packed["w2bd"], packed["b2"],
      packed["top_w1"], packed["top_b1"], packed["top_w2"], packed["top_b2"])
    return out[0], out[1]


# ---------------------------------------------------------------------------
# Deterministic parameter init (PyTorch-style uniform bounds) + packing
# ---------------------------------------------------------------------------

def _uniform(key, shape, fan_in):
    bound = 1.0 / math.sqrt(fan_in)
    return jax.random.uniform(key, shape, jnp.float32, -bound, bound)


def _linear(key, in_f, out_f):
    k1, k2 = jax.random.split(key)
    return _uniform(k1, (out_f, in_f), in_f), _uniform(k2, (out_f,), in_f)


def init_side_raw(key, L, win, CL, CG, H, O):
    """PyTorch-layout params for LocalAttention + GlobalAttention of one side."""
    ks = jax.random.split(key, 11)
    p = {}
    p["l_att_w"] = _uniform(ks[0], (win,), win)        # Conv2d(1,1,(win,1)).weight
    p["l_att_b"] = _uniform(ks[1], (1,), win)
    p["l_cnn_w"] = _uniform(ks[2], (CL,), 1)           # Conv2d(1,CL,(1,1)).weight
    p["l_cnn_b"] = _uniform(ks[3], (CL,), 1)
    p["l_fc1_w"], p["l_fc1_b"] = _linear(ks[4], CL * L, H)
    p["l_fc2_w"], p["l_fc2_b"] = _linear(ks[5], H, O)
    p["g_att_w"] = _uniform(ks[6], (L,), L)            # Conv2d(1,1,(L,1)).weight
    p["g_att_b"] = _uniform(ks[7], (1,), L)
    for i, ksz in enumerate(KSIZES):
        Lk = L - ksz + 1
        kk = jax.random.split(ks[8 + i], 4)
        p[f"g{i}_cnn_w"] = _uniform(kk[0], (CG, ksz), ksz)   # Conv2d(1,CG,(k,1)).weight
        p[f"g{i}_cnn_b"] = _uniform(kk[1], (CG,), ksz)
        p[f"g{i}_fc1_w"], p[f"g{i}_fc1_b"] = _linear(kk[2], CG * Lk, H)
        p[f"g{i}_fc2_w"], p[f"g{i}_fc2_b"] = _linear(kk[3], H, O)
    return p


def _block_diag_fc(p, L, CL, CG, H, O):
    """Fuse the four per-branch fcLayers into one block-diagonal weight pair.

    Slab layout: (CL + 3*CG) lane-aligned stripes of width L; local channel c
    at stripe c, global branch i channel c at stripe CL + i*CG + c, with only
    its first Lk = L - k + 1 lanes used (remaining rows stay zero).
    """
    n_stripes = CL + 3 * CG
    w1 = jnp.zeros((n_stripes * L, 4 * H), jnp.float32)
    w2 = jnp.zeros((4 * H, 4 * O), jnp.float32)
    # branch 0: local
    w1 = w1.at[0:CL * L, 0:H].set(p["l_fc1_w"].T)
    w2 = w2.at[0:H, 0:O].set(p["l_fc2_w"].T)
    b1 = [p["l_fc1_b"]]
    b2 = [p["l_fc2_b"]]
    # branches 1..3: global k = 2, 3, 4
    for i, ksz in enumerate(KSIZES):
        Lk = L - ksz + 1
        wg = p[f"g{i}_fc1_w"].T                       # (CG*Lk, H), row = c*Lk + t
        col = (1 + i) * H
        for c in range(CG):
            row = (CL + i * CG + c) * L
            w1 = w1.at[row:row + Lk, col:col + H].set(wg[c * Lk:(c + 1) * Lk])
        w2 = w2.at[col:col + H, (1 + i) * O:(2 + i) * O].set(p[f"g{i}_fc2_w"].T)
        b1.append(p[f"g{i}_fc1_b"])
        b2.append(p[f"g{i}_fc2_b"])
    return (w1, jnp.concatenate(b1).reshape(1, 4 * H),
            w2, jnp.concatenate(b2).reshape(1, 4 * O))


def pack_params(user, item, top, L, win, CL, CG, H, O):
    def stack(name):
        return jnp.stack([user[name], item[name]], axis=0)

    bd_u = _block_diag_fc(user, L, CL, CG, H, O)
    bd_i = _block_diag_fc(item, L, CL, CG, H, O)

    packed = {
        "loc_att_w": stack("l_att_w"),                      # (2, win)       SMEM
        "loc_att_b": stack("l_att_b"),                      # (2, 1)         SMEM
        "loc_cnn_w": stack("l_cnn_w"),                      # (2, CL)        SMEM
        "loc_cnn_b": stack("l_cnn_b"),                      # (2, CL)        SMEM
        "glob_att_w": stack("g_att_w").reshape(2, 1, L),    # (2, 1, L)      VMEM
        "glob_att_b": stack("g_att_b"),                     # (2, 1)         SMEM
        "w1bd": jnp.stack([bd_u[0], bd_i[0]]),              # (2, Kpad, 4H)  VMEM
        "b1":   jnp.stack([bd_u[1], bd_i[1]]),              # (2, 1, 4H)     VMEM
        "w2bd": jnp.stack([bd_u[2], bd_i[2]]),              # (2, 4H, 4O)    VMEM
        "b2":   jnp.stack([bd_u[3], bd_i[3]]),              # (2, 1, 4O)     VMEM
        "top_w1": top["w1"].T,                              # (4O, H) shared VMEM
        "top_b1": top["b1"].reshape(1, H),
        "top_w2": top["w2"].T,                              # (H, O)
        "top_b2": top["b2"].reshape(1, O),
    }
    for i in range(3):
        packed[f"g_cnn_w{i}"] = jnp.stack(
            [user[f"g{i}_cnn_w"].reshape(-1), item[f"g{i}_cnn_w"].reshape(-1)], axis=0)
        packed[f"g_cnn_b{i}"] = stack(f"g{i}_cnn_b")
    return packed


# ---------------------------------------------------------------------------
# Pure-JAX reference (mirrors the PyTorch module, unfused) for a sanity check
# ---------------------------------------------------------------------------

def _side_reference(p, x, L, win, CL, CG):
    pad = (win - 1) // 2
    xpad = jnp.pad(x, ((0, 0), (pad, pad)))
    logits = sum(p["l_att_w"][k] * xpad[:, k:k + L] for k in range(win)) + p["l_att_b"][0]
    s_loc = x * jax.nn.softmax(logits, axis=-1)
    feat = jnp.concatenate([jnp.tanh(p["l_cnn_w"][c] * s_loc + p["l_cnn_b"][c])
                            for c in range(CL)], axis=-1)
    h = jnp.maximum(feat @ p["l_fc1_w"].T + p["l_fc1_b"], 0.0)
    outs = [h @ p["l_fc2_w"].T + p["l_fc2_b"]]

    z = x @ p["g_att_w"][:, None] + p["g_att_b"][0]
    s_glo = x * jax.nn.sigmoid(z)
    for i, ksz in enumerate(KSIZES):
        Lk = L - ksz + 1
        chans = []
        for c in range(CG):
            acc = sum(p[f"g{i}_cnn_w"][c, j] * s_glo[:, j:j + Lk] for j in range(ksz))
            chans.append(jnp.tanh(acc + p[f"g{i}_cnn_b"][c]))
        feat = jnp.concatenate(chans, axis=-1)
        h = jnp.maximum(feat @ p[f"g{i}_fc1_w"].T + p[f"g{i}_fc1_b"], 0.0)
        outs.append(h @ p[f"g{i}_fc2_w"].T + p[f"g{i}_fc2_b"])
    return jnp.concatenate(outs, axis=-1)                   # (B, 4*O)


def reference_forward(user, item, top, xu, xi, L, win, CL, CG):
    def top_fc(c):
        h = jnp.maximum(c @ top["w1"].T + top["b1"], 0.0)
        return h @ top["w2"].T + top["b2"]
    return (top_fc(_side_reference(user, xu, L, win, CL, CG)),
            top_fc(_side_reference(item, xi, L, win, CL, CG)))


# ---------------------------------------------------------------------------
# Main
# ---------------------------------------------------------------------------

if __name__ == "__main__":
    # args: max_vis_len=16, ctx_win_size=5, channels_local=4, channels_global=4,
    #       hidden_size=32, output_size=8, batch=2 (dropout in eval mode)
    B, L, WIN = 2, 16, 5
    CL, CG, H, O = 4, 4, 32, 8

    key = jax.random.PRNGKey(0)
    kparam, kdata = jax.random.split(key)
    ku_p, ki_p, kt_p = jax.random.split(kparam, 3)
    user_raw = init_side_raw(ku_p, L, WIN, CL, CG, H, O)
    item_raw = init_side_raw(ki_p, L, WIN, CL, CG, H, O)
    kt1, kt2 = jax.random.split(kt_p)
    tw1, tb1 = _linear(kt1, 4 * O, H)
    tw2, tb2 = _linear(kt2, H, O)
    top_raw = dict(w1=tw1, b1=tb1, w2=tw2, b2=tb2)

    packed = pack_params(user_raw, item_raw, top_raw, L, WIN, CL, CG, H, O)

    ku, ki = jax.random.split(kdata)
    batch_userVis = jax.random.normal(ku, (B, L), jnp.float32)
    batch_itemVis = jax.random.normal(ki, (B, L), jnp.float32)

    fwd = jax.jit(functools.partial(vanra_vrl_forward, L=L, win=WIN,
                                    CL=CL, CG=CG, H=H, O=O))
    out_user, out_item = fwd(packed, batch_userVis, batch_itemVis)
    jax.block_until_ready((out_user, out_item))

    assert out_user.shape == (B, O) and out_item.shape == (B, O)
    assert out_user.dtype == jnp.float32 and out_item.dtype == jnp.float32

    # Sanity check vs. unfused pure-JAX reference (loose tol: EUP approx recip).
    ref_u, ref_i = reference_forward(user_raw, item_raw, top_raw,
                                     batch_userVis, batch_itemVis, L, WIN, CL, CG)
    err = max(float(jnp.max(jnp.abs(out_user - ref_u))),
              float(jnp.max(jnp.abs(out_item - ref_i))))
    assert err < 5e-2, f"mismatch vs pure-JAX reference: {err}"

    print("KERNEL_OK")
</pallas_src>

<mosaic_0001>
module attributes {stable_mosaic.version = 11 : i64} {
  func.func @fused_vanra_kernel(%arg0: i32, %arg1: memref<1x2x16xf32, #tpu.memory_space<vmem>>, %arg2: memref<2x5xf32, #tpu.memory_space<smem>>, %arg3: memref<2x1xf32, #tpu.memory_space<smem>>, %arg4: memref<2x4xf32, #tpu.memory_space<smem>>, %arg5: memref<2x4xf32, #tpu.memory_space<smem>>, %arg6: memref<1x1x16xf32, #tpu.memory_space<vmem>>, %arg7: memref<2x1xf32, #tpu.memory_space<smem>>, %arg8: memref<2x8xf32, #tpu.memory_space<smem>>, %arg9: memref<2x4xf32, #tpu.memory_space<smem>>, %arg10: memref<2x12xf32, #tpu.memory_space<smem>>, %arg11: memref<2x4xf32, #tpu.memory_space<smem>>, %arg12: memref<2x16xf32, #tpu.memory_space<smem>>, %arg13: memref<2x4xf32, #tpu.memory_space<smem>>, %arg14: memref<1x256x128xf32, #tpu.memory_space<vmem>>, %arg15: memref<1x1x128xf32, #tpu.memory_space<vmem>>, %arg16: memref<1x128x32xf32, #tpu.memory_space<vmem>>, %arg17: memref<1x1x32xf32, #tpu.memory_space<vmem>>, %arg18: memref<32x32xf32, #tpu.memory_space<vmem>>, %arg19: memref<1x32xf32, #tpu.memory_space<vmem>>, %arg20: memref<32x8xf32, #tpu.memory_space<vmem>>, %arg21: memref<1x8xf32, #tpu.memory_space<vmem>>, %arg22: memref<1x2x8xf32, #tpu.memory_space<vmem>>, %arg23: memref<2x20xf32, #tpu.memory_space<vmem>>, %arg24: memref<2x256xf32, #tpu.memory_space<vmem>>) attributes {dimension_semantics = [#tpu.dimension_semantics<parallel>], iteration_bounds = array<i64: 2>, scalar_prefetch = 0 : i64, scratch_operands = 2 : i64, tpu.core_type = #tpu.core_type<tc>, window_params = [{transform_indices = @transform_0, window_bounds = array<i64: 1, 2, 16>}, {transform_indices = @transform_1, window_bounds = array<i64: 2, 5>}, {transform_indices = @transform_2, window_bounds = array<i64: 2, 1>}, {transform_indices = @transform_3, window_bounds = array<i64: 2, 4>}, {transform_indices = @transform_4, window_bounds = array<i64: 2, 4>}, {transform_indices = @transform_5, window_bounds = array<i64: 1, 1, 16>}, {transform_indices = @transform_6, window_bounds = array<i64: 2, 1>}, {transform_indices = @transform_7, window_bounds = array<i64: 2, 8>}, {transform_indices = @transform_8, window_bounds = array<i64: 2, 4>}, {transform_indices = @transform_9, window_bounds = array<i64: 2, 12>}, {transform_indices = @transform_10, window_bounds = array<i64: 2, 4>}, {transform_indices = @transform_11, window_bounds = array<i64: 2, 16>}, {transform_indices = @transform_12, window_bounds = array<i64: 2, 4>}, {transform_indices = @transform_13, window_bounds = array<i64: 1, 256, 128>}, {transform_indices = @transform_14, window_bounds = array<i64: 1, 1, 128>}, {transform_indices = @transform_15, window_bounds = array<i64: 1, 128, 32>}, {transform_indices = @transform_16, window_bounds = array<i64: 1, 1, 32>}, {pipeline_mode = #tpu.pipeline_mode<synchronous>, transform_indices = @transform_17, window_bounds = array<i64: 32, 32>}, {pipeline_mode = #tpu.pipeline_mode<synchronous>, transform_indices = @transform_18, window_bounds = array<i64: 1, 32>}, {pipeline_mode = #tpu.pipeline_mode<synchronous>, transform_indices = @transform_19, window_bounds = array<i64: 32, 8>}, {pipeline_mode = #tpu.pipeline_mode<synchronous>, transform_indices = @transform_20, window_bounds = array<i64: 1, 8>}, {transform_indices = @transform_21, window_bounds = array<i64: 1, 2, 8>}]} {
    %c0 = arith.constant 0 : index
    %c0_0 = arith.constant 0 : index
    %c0_1 = arith.constant 0 : index
    %0 = vector.load %arg1[%c0, %c0_0, %c0_1] : memref<1x2x16xf32, #tpu.memory_space<vmem>>, vector<1x2x16xf32>
    %1 = vector.shape_cast %0 : vector<1x2x16xf32> to vector<2x16xf32>
    %cst = arith.constant 0.000000e+00 : f32
    %2 = vector.broadcast %cst : f32 to vector<2x20xf32>
    %c0_2 = arith.constant 0 : index
    %c0_3 = arith.constant 0 : index
    %3 = vector.load %arg23[%c0_2, %c0_3] : memref<2x20xf32, #tpu.memory_space<vmem>>, vector<2x20xf32>
    tpu.vector_store %arg23[%c0_2, %c0_3], %2 {strides = array<i32>} : memref<2x20xf32, #tpu.memory_space<vmem>>, vector<2x20xf32>,
    %c0_4 = arith.constant 0 : index
    %c2 = arith.constant 2 : index
    %4 = vector.load %arg23[%c0_4, %c2] : memref<2x20xf32, #tpu.memory_space<vmem>>, vector<2x16xf32>
    tpu.vector_store %arg23[%c0_4, %c2], %1 {strides = array<i32>} : memref<2x20xf32, #tpu.memory_space<vmem>>, vector<2x16xf32>,
    %c0_5 = arith.constant 0 : index
    %c0_6 = arith.constant 0 : index
    %5 = vector.load %arg23[%c0_5, %c0_6] : memref<2x20xf32, #tpu.memory_space<vmem>>, vector<2x20xf32>
    %cst_7 = arith.constant 0.000000e+00 : f32
    %6 = vector.broadcast %cst_7 : f32 to vector<2x16xf32>
    %7 = arith.index_cast %arg0 : i32 to index
    %c0_8 = arith.constant 0 : index
    %8 = memref.load %arg2[%7, %c0_8] : memref<2x5xf32, #tpu.memory_space<smem>>
    %9 = vector.extract_strided_slice %5 {offsets = [0, 0], sizes = [2, 16], strides = [1, 1]} : vector<2x20xf32> to vector<2x16xf32>
    %10 = vector.broadcast %8 : f32 to vector<2x16xf32>
    %11 = arith.mulf %10, %9 : vector<2x16xf32>
    %12 = arith.addf %6, %11 : vector<2x16xf32>
    %13 = arith.index_cast %arg0 : i32 to index
    %c1 = arith.constant 1 : index
    %14 = memref.load %arg2[%13, %c1] : memref<2x5xf32, #tpu.memory_space<smem>>
    %15 = vector.extract_strided_slice %5 {offsets = [0, 1], sizes = [2, 16], strides = [1, 1]} : vector<2x20xf32> to vector<2x16xf32>
    %16 = vector.broadcast %14 : f32 to vector<2x16xf32>
    %17 = arith.mulf %16, %15 : vector<2x16xf32>
    %18 = arith.addf %12, %17 : vector<2x16xf32>
    %19 = arith.index_cast %arg0 : i32 to index
    %c2_9 = arith.constant 2 : index
    %20 = memref.load %arg2[%19, %c2_9] : memref<2x5xf32, #tpu.memory_space<smem>>
    %21 = vector.extract_strided_slice %5 {offsets = [0, 2], sizes = [2, 16], strides = [1, 1]} : vector<2x20xf32> to vector<2x16xf32>
    %22 = vector.broadcast %20 : f32 to vector<2x16xf32>
    %23 = arith.mulf %22, %21 : vector<2x16xf32>
    %24 = arith.addf %18, %23 : vector<2x16xf32>
    %25 = arith.index_cast %arg0 : i32 to index
    %c3 = arith.constant 3 : index
    %26 = memref.load %arg2[%25, %c3] : memref<2x5xf32, #tpu.memory_space<smem>>
    %27 = vector.extract_strided_slice %5 {offsets = [0, 3], sizes = [2, 16], strides = [1, 1]} : vector<2x20xf32> to vector<2x16xf32>
    %28 = vector.broadcast %26 : f32 to vector<2x16xf32>
    %29 = arith.mulf %28, %27 : vector<2x16xf32>
    %30 = arith.addf %24, %29 : vector<2x16xf32>
    %31 = arith.index_cast %arg0 : i32 to index
    %c4 = arith.constant 4 : index
    %32 = memref.load %arg2[%31, %c4] : memref<2x5xf32, #tpu.memory_space<smem>>
    %33 = vector.extract_strided_slice %5 {offsets = [0, 4], sizes = [2, 16], strides = [1, 1]} : vector<2x20xf32> to vector<2x16xf32>
    %34 = vector.broadcast %32 : f32 to vector<2x16xf32>
    %35 = arith.mulf %34, %33 : vector<2x16xf32>
    %36 = arith.addf %30, %35 : vector<2x16xf32>
    %37 = arith.index_cast %arg0 : i32 to index
    %c0_10 = arith.constant 0 : index
    %38 = memref.load %arg3[%37, %c0_10] : memref<2x1xf32, #tpu.memory_space<smem>>
    %39 = vector.broadcast %38 : f32 to vector<2x16xf32>
    %40 = arith.addf %36, %39 : vector<2x16xf32>
    %cst_11 = arith.constant dense<0xFF800000> : vector<2xf32>
    %41 = vector.multi_reduction <maximumf>, %40, %cst_11 [1] : vector<2x16xf32> to vector<2xf32>
    %42 = vector.shape_cast %41 : vector<2xf32> to vector<2x1xf32>
    %43 = vector.broadcast %42 : vector<2x1xf32> to vector<2x16xf32>
    %44 = arith.subf %40, %43 : vector<2x16xf32>
    %45 = math.exp %44 : vector<2x16xf32>
    %cst_12 = arith.constant dense<0.000000e+00> : vector<2xf32>
    %46 = vector.multi_reduction <add>, %45, %cst_12 [1] : vector<2x16xf32> to vector<2xf32>
    %47 = vector.shape_cast %46 : vector<2xf32> to vector<2x1xf32>
    %48 = tpu.reciprocal %47 {approx = true} : vector<2x1xf32> -> vector<2x1xf32>
    %49 = vector.broadcast %48 : vector<2x1xf32> to vector<2x16xf32>
    %50 = arith.mulf %45, %49 : vector<2x16xf32>
    %51 = arith.mulf %1, %50 : vector<2x16xf32>
    %c0_13 = arith.constant 0 : index
    %c0_14 = arith.constant 0 : index
    %c0_15 = arith.constant 0 : index
    %52 = vector.load %arg6[%c0_13, %c0_14, %c0_15] : memref<1x1x16xf32, #tpu.memory_space<vmem>>, vector<1x1x16xf32>
    %53 = vector.shape_cast %52 : vector<1x1x16xf32> to vector<1x16xf32>
    %54 = vector.broadcast %53 : vector<1x16xf32> to vector<2x16xf32>
    %55 = arith.mulf %1, %54 : vector<2x16xf32>
    %cst_16 = arith.constant dense<0.000000e+00> : vector<2xf32>
    %56 = vector.multi_reduction <add>, %55, %cst_16 [1] : vector<2x16xf32> to vector<2xf32>
    %57 = vector.shape_cast %56 : vector<2xf32> to vector<2x1xf32>
    %58 = arith.index_cast %arg0 : i32 to index
    %c0_17 = arith.constant 0 : index
    %59 = memref.load %arg7[%58, %c0_17] : memref<2x1xf32, #tpu.memory_space<smem>>
    %60 = vector.broadcast %59 : f32 to vector<2x1xf32>
    %61 = arith.addf %57, %60 : vector<2x1xf32>
    %cst_18 = arith.constant 0.000000e+00 : f32
    %62 = vector.broadcast %cst_18 : f32 to vector<2x1xf32>
    %63 = arith.subf %62, %61 : vector<2x1xf32>
    %64 = math.exp %63 : vector<2x1xf32>
    %cst_19 = arith.constant 1.000000e+00 : f32
    %65 = vector.broadcast %cst_19 : f32 to vector<2x1xf32>
    %66 = arith.addf %65, %64 : vector<2x1xf32>
    %67 = tpu.reciprocal %66 {approx = true} : vector<2x1xf32> -> vector<2x1xf32>
    %68 = vector.broadcast %67 : vector<2x1xf32> to vector<2x16xf32>
    %69 = arith.mulf %1, %68 : vector<2x16xf32>
    %cst_20 = arith.constant 0.000000e+00 : f32
    %70 = vector.broadcast %cst_20 : f32 to vector<2x256xf32>
    %c0_21 = arith.constant 0 : index
    %c0_22 = arith.constant 0 : index
    %71 = vector.load %arg24[%c0_21, %c0_22] : memref<2x256xf32, #tpu.memory_space<vmem>>, vector<2x256xf32>
    tpu.vector_store %arg24[%c0_21, %c0_22], %70 {strides = array<i32>} : memref<2x256xf32, #tpu.memory_space<vmem>>, vector<2x256xf32>,
    %72 = arith.index_cast %arg0 : i32 to index
    %c0_23 = arith.constant 0 : index
    %73 = memref.load %arg4[%72, %c0_23] : memref<2x4xf32, #tpu.memory_space<smem>>
    %74 = vector.broadcast %73 : f32 to vector<2x16xf32>
    %75 = arith.mulf %74, %51 : vector<2x16xf32>
    %76 = arith.index_cast %arg0 : i32 to index
    %c0_24 = arith.constant 0 : index
    %77 = memref.load %arg5[%76, %c0_24] : memref<2x4xf32, #tpu.memory_space<smem>>
    %78 = vector.broadcast %77 : f32 to vector<2x16xf32>
    %79 = arith.addf %75, %78 : vector<2x16xf32>
    %80 = math.tanh %79 : vector<2x16xf32>
    %c0_25 = arith.constant 0 : index
    %c0_26 = arith.constant 0 : index
    %81 = vector.load %arg24[%c0_25, %c0_26] : memref<2x256xf32, #tpu.memory_space<vmem>>, vector<2x16xf32>
    tpu.vector_store %arg24[%c0_25, %c0_26], %80 {strides = array<i32>} : memref<2x256xf32, #tpu.memory_space<vmem>>, vector<2x16xf32>,
    %82 = arith.index_cast %arg0 : i32 to index
    %c1_27 = arith.constant 1 : index
    %83 = memref.load %arg4[%82, %c1_27] : memref<2x4xf32, #tpu.memory_space<smem>>
    %84 = vector.broadcast %83 : f32 to vector<2x16xf32>
    %85 = arith.mulf %84, %51 : vector<2x16xf32>
    %86 = arith.index_cast %arg0 : i32 to index
    %c1_28 = arith.constant 1 : index
    %87 = memref.load %arg5[%86, %c1_28] : memref<2x4xf32, #tpu.memory_space<smem>>
    %88 = vector.broadcast %87 : f32 to vector<2x16xf32>
    %89 = arith.addf %85, %88 : vector<2x16xf32>
    %90 = math.tanh %89 : vector<2x16xf32>
    %c0_29 = arith.constant 0 : index
    %c16 = arith.constant 16 : index
    %91 = vector.load %arg24[%c0_29, %c16] : memref<2x256xf32, #tpu.memory_space<vmem>>, vector<2x16xf32>
    tpu.vector_store %arg24[%c0_29, %c16], %90 {strides = array<i32>} : memref<2x256xf32, #tpu.memory_space<vmem>>, vector<2x16xf32>,
    %92 = arith.index_cast %arg0 : i32 to index
    %c2_30 = arith.constant 2 : index
    %93 = memref.load %arg4[%92, %c2_30] : memref<2x4xf32, #tpu.memory_space<smem>>
    %94 = vector.broadcast %93 : f32 to vector<2x16xf32>
    %95 = arith.mulf %94, %51 : vector<2x16xf32>
    %96 = arith.index_cast %arg0 : i32 to index
    %c2_31 = arith.constant 2 : index
    %97 = memref.load %arg5[%96, %c2_31] : memref<2x4xf32, #tpu.memory_space<smem>>
    %98 = vector.broadcast %97 : f32 to vector<2x16xf32>
    %99 = arith.addf %95, %98 : vector<2x16xf32>
    %100 = math.tanh %99 : vector<2x16xf32>
    %c0_32 = arith.constant 0 : index
    %c32 = arith.constant 32 : index
    %101 = vector.load %arg24[%c0_32, %c32] : memref<2x256xf32, #tpu.memory_space<vmem>>, vector<2x16xf32>
    tpu.vector_store %arg24[%c0_32, %c32], %100 {strides = array<i32>} : memref<2x256xf32, #tpu.memory_space<vmem>>, vector<2x16xf32>,
    %102 = arith.index_cast %arg0 : i32 to index
    %c3_33 = arith.constant 3 : index
    %103 = memref.load %arg4[%102, %c3_33] : memref<2x4xf32, #tpu.memory_space<smem>>
    %104 = vector.broadcast %103 : f32 to vector<2x16xf32>
    %105 = arith.mulf %104, %51 : vector<2x16xf32>
    %106 = arith.index_cast %arg0 : i32 to index
    %c3_34 = arith.constant 3 : index
    %107 = memref.load %arg5[%106, %c3_34] : memref<2x4xf32, #tpu.memory_space<smem>>
    %108 = vector.broadcast %107 : f32 to vector<2x16xf32>
    %109 = arith.addf %105, %108 : vector<2x16xf32>
    %110 = math.tanh %109 : vector<2x16xf32>
    %c0_35 = arith.constant 0 : index
    %c48 = arith.constant 48 : index
    %111 = vector.load %arg24[%c0_35, %c48] : memref<2x256xf32, #tpu.memory_space<vmem>>, vector<2x16xf32>
    tpu.vector_store %arg24[%c0_35, %c48], %110 {strides = array<i32>} : memref<2x256xf32, #tpu.memory_space<vmem>>, vector<2x16xf32>,
    %112 = vector.extract_strided_slice %69 {offsets = [0, 0], sizes = [2, 15], strides = [1, 1]} : vector<2x16xf32> to vector<2x15xf32>
    %113 = vector.extract_strided_slice %69 {offsets = [0, 1], sizes = [2, 15], strides = [1, 1]} : vector<2x16xf32> to vector<2x15xf32>
    %cst_36 = arith.constant 0.000000e+00 : f32
    %114 = vector.broadcast %cst_36 : f32 to vector<2x15xf32>
    %115 = arith.index_cast %arg0 : i32 to index
    %c0_37 = arith.constant 0 : index
    %116 = memref.load %arg8[%115, %c0_37] : memref<2x8xf32, #tpu.memory_space<smem>>
    %117 = vector.broadcast %116 : f32 to vector<2x15xf32>
    %118 = arith.mulf %117, %112 : vector<2x15xf32>
    %119 = arith.addf %114, %118 : vector<2x15xf32>
    %120 = arith.index_cast %arg0 : i32 to index
    %c1_38 = arith.constant 1 : index
    %121 = memref.load %arg8[%120, %c1_38] : memref<2x8xf32, #tpu.memory_space<smem>>
    %122 = vector.broadcast %121 : f32 to vector<2x15xf32>
    %123 = arith.mulf %122, %113 : vector<2x15xf32>
    %124 = arith.addf %119, %123 : vector<2x15xf32>
    %125 = arith.index_cast %arg0 : i32 to index
    %c0_39 = arith.constant 0 : index
    %126 = memref.load %arg9[%125, %c0_39] : memref<2x4xf32, #tpu.memory_space<smem>>
    %127 = vector.broadcast %126 : f32 to vector<2x15xf32>
    %128 = arith.addf %124, %127 : vector<2x15xf32>
    %129 = math.tanh %128 : vector<2x15xf32>
    %c0_40 = arith.constant 0 : index
    %c64 = arith.constant 64 : index
    %130 = vector.load %arg24[%c0_40, %c64] : memref<2x256xf32, #tpu.memory_space<vmem>>, vector<2x15xf32>
    tpu.vector_store %arg24[%c0_40, %c64], %129 {strides = array<i32>} : memref<2x256xf32, #tpu.memory_space<vmem>>, vector<2x15xf32>,
    %cst_41 = arith.constant 0.000000e+00 : f32
    %131 = vector.broadcast %cst_41 : f32 to vector<2x15xf32>
    %132 = arith.index_cast %arg0 : i32 to index
    %c2_42 = arith.constant 2 : index
    %133 = memref.load %arg8[%132, %c2_42] : memref<2x8xf32, #tpu.memory_space<smem>>
    %134 = vector.broadcast %133 : f32 to vector<2x15xf32>
    %135 = arith.mulf %134, %112 : vector<2x15xf32>
    %136 = arith.addf %131, %135 : vector<2x15xf32>
    %137 = arith.index_cast %arg0 : i32 to index
    %c3_43 = arith.constant 3 : index
    %138 = memref.load %arg8[%137, %c3_43] : memref<2x8xf32, #tpu.memory_space<smem>>
    %139 = vector.broadcast %138 : f32 to vector<2x15xf32>
    %140 = arith.mulf %139, %113 : vector<2x15xf32>
    %141 = arith.addf %136, %140 : vector<2x15xf32>
    %142 = arith.index_cast %arg0 : i32 to index
    %c1_44 = arith.constant 1 : index
    %143 = memref.load %arg9[%142, %c1_44] : memref<2x4xf32, #tpu.memory_space<smem>>
    %144 = vector.broadcast %143 : f32 to vector<2x15xf32>
    %145 = arith.addf %141, %144 : vector<2x15xf32>
    %146 = math.tanh %145 : vector<2x15xf32>
    %c0_45 = arith.constant 0 : index
    %c80 = arith.constant 80 : index
    %147 = vector.load %arg24[%c0_45, %c80] : memref<2x256xf32, #tpu.memory_space<vmem>>, vector<2x15xf32>
    tpu.vector_store %arg24[%c0_45, %c80], %146 {strides = array<i32>} : memref<2x256xf32, #tpu.memory_space<vmem>>, vector<2x15xf32>,
    %cst_46 = arith.constant 0.000000e+00 : f32
    %148 = vector.broadcast %cst_46 : f32 to vector<2x15xf32>
    %149 = arith.index_cast %arg0 : i32 to index
    %c4_47 = arith.constant 4 : index
    %150 = memref.load %arg8[%149, %c4_47] : memref<2x8xf32, #tpu.memory_space<smem>>
    %151 = vector.broadcast %150 : f32 to vector<2x15xf32>
    %152 = arith.mulf %151, %112 : vector<2x15xf32>
    %153 = arith.addf %148, %152 : vector<2x15xf32>
    %154 = arith.index_cast %arg0 : i32 to index
    %c5 = arith.constant 5 : index
    %155 = memref.load %arg8[%154, %c5] : memref<2x8xf32, #tpu.memory_space<smem>>
    %156 = vector.broadcast %155 : f32 to vector<2x15xf32>
    %157 = arith.mulf %156, %113 : vector<2x15xf32>
    %158 = arith.addf %153, %157 : vector<2x15xf32>
    %159 = arith.index_cast %arg0 : i32 to index
    %c2_48 = arith.constant 2 : index
    %160 = memref.load %arg9[%159, %c2_48] : memref<2x4xf32, #tpu.memory_space<smem>>
    %161 = vector.broadcast %160 : f32 to vector<2x15xf32>
    %162 = arith.addf %158, %161 : vector<2x15xf32>
    %163 = math.tanh %162 : vector<2x15xf32>
    %c0_49 = arith.constant 0 : index
    %c96 = arith.constant 96 : index
    %164 = vector.load %arg24[%c0_49, %c96] : memref<2x256xf32, #tpu.memory_space<vmem>>, vector<2x15xf32>
    tpu.vector_store %arg24[%c0_49, %c96], %163 {strides = array<i32>} : memref<2x256xf32, #tpu.memory_space<vmem>>, vector<2x15xf32>,
    %cst_50 = arith.constant 0.000000e+00 : f32
    %165 = vector.broadcast %cst_50 : f32 to vector<2x15xf32>
    %166 = arith.index_cast %arg0 : i32 to index
    %c6 = arith.constant 6 : index
    %167 = memref.load %arg8[%166, %c6] : memref<2x8xf32, #tpu.memory_space<smem>>
    %168 = vector.broadcast %167 : f32 to vector<2x15xf32>
    %169 = arith.mulf %168, %112 : vector<2x15xf32>
    %170 = arith.addf %165, %169 : vector<2x15xf32>
    %171 = arith.index_cast %arg0 : i32 to index
    %c7 = arith.constant 7 : index
    %172 = memref.load %arg8[%171, %c7] : memref<2x8xf32, #tpu.memory_space<smem>>
    %173 = vector.broadcast %172 : f32 to vector<2x15xf32>
    %174 = arith.mulf %173, %113 : vector<2x15xf32>
    %175 = arith.addf %170, %174 : vector<2x15xf32>
    %176 = arith.index_cast %arg0 : i32 to index
    %c3_51 = arith.constant 3 : index
    %177 = memref.load %arg9[%176, %c3_51] : memref<2x4xf32, #tpu.memory_space<smem>>
    %178 = vector.broadcast %177 : f32 to vector<2x15xf32>
    %179 = arith.addf %175, %178 : vector<2x15xf32>
    %180 = math.tanh %179 : vector<2x15xf32>
    %c0_52 = arith.constant 0 : index
    %c112 = arith.constant 112 : index
    %181 = vector.load %arg24[%c0_52, %c112] : memref<2x256xf32, #tpu.memory_space<vmem>>, vector<2x15xf32>
    tpu.vector_store %arg24[%c0_52, %c112], %180 {strides = array<i32>} : memref<2x256xf32, #tpu.memory_space<vmem>>, vector<2x15xf32>,
    %182 = vector.extract_strided_slice %69 {offsets = [0, 0], sizes = [2, 14], strides = [1, 1]} : vector<2x16xf32> to vector<2x14xf32>
    %183 = vector.extract_strided_slice %69 {offsets = [0, 1], sizes = [2, 14], strides = [1, 1]} : vector<2x16xf32> to vector<2x14xf32>
    %184 = vector.extract_strided_slice %69 {offsets = [0, 2], sizes = [2, 14], strides = [1, 1]} : vector<2x16xf32> to vector<2x14xf32>
    %cst_53 = arith.constant 0.000000e+00 : f32
    %185 = vector.broadcast %cst_53 : f32 to vector<2x14xf32>
    %186 = arith.index_cast %arg0 : i32 to index
    %c0_54 = arith.constant 0 : index
    %187 = memref.load %arg10[%186, %c0_54] : memref<2x12xf32, #tpu.memory_space<smem>>
    %188 = vector.broadcast %187 : f32 to vector<2x14xf32>
    %189 = arith.mulf %188, %182 : vector<2x14xf32>
    %190 = arith.addf %185, %189 : vector<2x14xf32>
    %191 = arith.index_cast %arg0 : i32 to index
    %c1_55 = arith.constant 1 : index
    %192 = memref.load %arg10[%191, %c1_55] : memref<2x12xf32, #tpu.memory_space<smem>>
    %193 = vector.broadcast %192 : f32 to vector<2x14xf32>
    %194 = arith.mulf %193, %183 : vector<2x14xf32>
    %195 = arith.addf %190, %194 : vector<2x14xf32>
    %196 = arith.index_cast %arg0 : i32 to index
    %c2_56 = arith.constant 2 : index
    %197 = memref.load %arg10[%196, %c2_56] : memref<2x12xf32, #tpu.memory_space<smem>>
    %198 = vector.broadcast %197 : f32 to vector<2x14xf32>
    %199 = arith.mulf %198, %184 : vector<2x14xf32>
    %200 = arith.addf %195, %199 : vector<2x14xf32>
    %201 = arith.index_cast %arg0 : i32 to index
    %c0_57 = arith.constant 0 : index
    %202 = memref.load %arg11[%201, %c0_57] : memref<2x4xf32, #tpu.memory_space<smem>>
    %203 = vector.broadcast %202 : f32 to vector<2x14xf32>
    %204 = arith.addf %200, %203 : vector<2x14xf32>
    %205 = math.tanh %204 : vector<2x14xf32>
    %c0_58 = arith.constant 0 : index
    %c128 = arith.constant 128 : index
    %206 = vector.load %arg24[%c0_58, %c128] : memref<2x256xf32, #tpu.memory_space<vmem>>, vector<2x14xf32>
    tpu.vector_store %arg24[%c0_58, %c128], %205 {strides = array<i32>} : memref<2x256xf32, #tpu.memory_space<vmem>>, vector<2x14xf32>,
    %cst_59 = arith.constant 0.000000e+00 : f32
    %207 = vector.broadcast %cst_59 : f32 to vector<2x14xf32>
    %208 = arith.index_cast %arg0 : i32 to index
    %c3_60 = arith.constant 3 : index
    %209 = memref.load %arg10[%208, %c3_60] : memref<2x12xf32, #tpu.memory_space<smem>>
    %210 = vector.broadcast %209 : f32 to vector<2x14xf32>
    %211 = arith.mulf %210, %182 : vector<2x14xf32>
    %212 = arith.addf %207, %211 : vector<2x14xf32>
    %213 = arith.index_cast %arg0 : i32 to index
    %c4_61 = arith.constant 4 : index
    %214 = memref.load %arg10[%213, %c4_61] : memref<2x12xf32, #tpu.memory_space<smem>>
    %215 = vector.broadcast %214 : f32 to vector<2x14xf32>
    %216 = arith.mulf %215, %183 : vector<2x14xf32>
    %217 = arith.addf %212, %216 : vector<2x14xf32>
    %218 = arith.index_cast %arg0 : i32 to index
    %c5_62 = arith.constant 5 : index
    %219 = memref.load %arg10[%218, %c5_62] : memref<2x12xf32, #tpu.memory_space<smem>>
    %220 = vector.broadcast %219 : f32 to vector<2x14xf32>
    %221 = arith.mulf %220, %184 : vector<2x14xf32>
    %222 = arith.addf %217, %221 : vector<2x14xf32>
    %223 = arith.index_cast %arg0 : i32 to index
    %c1_63 = arith.constant 1 : index
    %224 = memref.load %arg11[%223, %c1_63] : memref<2x4xf32, #tpu.memory_space<smem>>
    %225 = vector.broadcast %224 : f32 to vector<2x14xf32>
    %226 = arith.addf %222, %225 : vector<2x14xf32>
    %227 = math.tanh %226 : vector<2x14xf32>
    %c0_64 = arith.constant 0 : index
    %c144 = arith.constant 144 : index
    %228 = vector.load %arg24[%c0_64, %c144] : memref<2x256xf32, #tpu.memory_space<vmem>>, vector<2x14xf32>
    tpu.vector_store %arg24[%c0_64, %c144], %227 {strides = array<i32>} : memref<2x256xf32, #tpu.memory_space<vmem>>, vector<2x14xf32>,
    %cst_65 = arith.constant 0.000000e+00 : f32
    %229 = vector.broadcast %cst_65 : f32 to vector<2x14xf32>
    %230 = arith.index_cast %arg0 : i32 to index
    %c6_66 = arith.constant 6 : index
    %231 = memref.load %arg10[%230, %c6_66] : memref<2x12xf32, #tpu.memory_space<smem>>
    %232 = vector.broadcast %231 : f32 to vector<2x14xf32>
    %233 = arith.mulf %232, %182 : vector<2x14xf32>
    %234 = arith.addf %229, %233 : vector<2x14xf32>
    %235 = arith.index_cast %arg0 : i32 to index
    %c7_67 = arith.constant 7 : index
    %236 = memref.load %arg10[%235, %c7_67] : memref<2x12xf32, #tpu.memory_space<smem>>
    %237 = vector.broadcast %236 : f32 to vector<2x14xf32>
    %238 = arith.mulf %237, %183 : vector<2x14xf32>
    %239 = arith.addf %234, %238 : vector<2x14xf32>
    %240 = arith.index_cast %arg0 : i32 to index
    %c8 = arith.constant 8 : index
    %241 = memref.load %arg10[%240, %c8] : memref<2x12xf32, #tpu.memory_space<smem>>
    %242 = vector.broadcast %241 : f32 to vector<2x14xf32>
    %243 = arith.mulf %242, %184 : vector<2x14xf32>
    %244 = arith.addf %239, %243 : vector<2x14xf32>
    %245 = arith.index_cast %arg0 : i32 to index
    %c2_68 = arith.constant 2 : index
    %246 = memref.load %arg11[%245, %c2_68] : memref<2x4xf32, #tpu.memory_space<smem>>
    %247 = vector.broadcast %246 : f32 to vector<2x14xf32>
    %248 = arith.addf %244, %247 : vector<2x14xf32>
    %249 = math.tanh %248 : vector<2x14xf32>
    %c0_69 = arith.constant 0 : index
    %c160 = arith.constant 160 : index
    %250 = vector.load %arg24[%c0_69, %c160] : memref<2x256xf32, #tpu.memory_space<vmem>>, vector<2x14xf32>
    tpu.vector_store %arg24[%c0_69, %c160], %249 {strides = array<i32>} : memref<2x256xf32, #tpu.memory_space<vmem>>, vector<2x14xf32>,
    %cst_70 = arith.constant 0.000000e+00 : f32
    %251 = vector.broadcast %cst_70 : f32 to vector<2x14xf32>
    %252 = arith.index_cast %arg0 : i32 to index
    %c9 = arith.constant 9 : index
    %253 = memref.load %arg10[%252, %c9] : memref<2x12xf32, #tpu.memory_space<smem>>
    %254 = vector.broadcast %253 : f32 to vector<2x14xf32>
    %255 = arith.mulf %254, %182 : vector<2x14xf32>
    %256 = arith.addf %251, %255 : vector<2x14xf32>
    %257 = arith.index_cast %arg0 : i32 to index
    %c10 = arith.constant 10 : index
    %258 = memref.load %arg10[%257, %c10] : memref<2x12xf32, #tpu.memory_space<smem>>
    %259 = vector.broadcast %258 : f32 to vector<2x14xf32>
    %260 = arith.mulf %259, %183 : vector<2x14xf32>
    %261 = arith.addf %256, %260 : vector<2x14xf32>
    %262 = arith.index_cast %arg0 : i32 to index
    %c11 = arith.constant 11 : index
    %263 = memref.load %arg10[%262, %c11] : memref<2x12xf32, #tpu.memory_space<smem>>
    %264 = vector.broadcast %263 : f32 to vector<2x14xf32>
    %265 = arith.mulf %264, %184 : vector<2x14xf32>
    %266 = arith.addf %261, %265 : vector<2x14xf32>
    %267 = arith.index_cast %arg0 : i32 to index
    %c3_71 = arith.constant 3 : index
    %268 = memref.load %arg11[%267, %c3_71] : memref<2x4xf32, #tpu.memory_space<smem>>
    %269 = vector.broadcast %268 : f32 to vector<2x14xf32>
    %270 = arith.addf %266, %269 : vector<2x14xf32>
    %271 = math.tanh %270 : vector<2x14xf32>
    %c0_72 = arith.constant 0 : index
    %c176 = arith.constant 176 : index
    %272 = vector.load %arg24[%c0_72, %c176] : memref<2x256xf32, #tpu.memory_space<vmem>>, vector<2x14xf32>
    tpu.vector_store %arg24[%c0_72, %c176], %271 {strides = array<i32>} : memref<2x256xf32, #tpu.memory_space<vmem>>, vector<2x14xf32>,
    %273 = vector.extract_strided_slice %69 {offsets = [0, 0], sizes = [2, 13], strides = [1, 1]} : vector<2x16xf32> to vector<2x13xf32>
    %274 = vector.extract_strided_slice %69 {offsets = [0, 1], sizes = [2, 13], strides = [1, 1]} : vector<2x16xf32> to vector<2x13xf32>
    %275 = vector.extract_strided_slice %69 {offsets = [0, 2], sizes = [2, 13], strides = [1, 1]} : vector<2x16xf32> to vector<2x13xf32>
    %276 = vector.extract_strided_slice %69 {offsets = [0, 3], sizes = [2, 13], strides = [1, 1]} : vector<2x16xf32> to vector<2x13xf32>
    %cst_73 = arith.constant 0.000000e+00 : f32
    %277 = vector.broadcast %cst_73 : f32 to vector<2x13xf32>
    %278 = arith.index_cast %arg0 : i32 to index
    %c0_74 = arith.constant 0 : index
    %279 = memref.load %arg12[%278, %c0_74] : memref<2x16xf32, #tpu.memory_space<smem>>
    %280 = vector.broadcast %279 : f32 to vector<2x13xf32>
    %281 = arith.mulf %280, %273 : vector<2x13xf32>
    %282 = arith.addf %277, %281 : vector<2x13xf32>
    %283 = arith.index_cast %arg0 : i32 to index
    %c1_75 = arith.constant 1 : index
    %284 = memref.load %arg12[%283, %c1_75] : memref<2x16xf32, #tpu.memory_space<smem>>
    %285 = vector.broadcast %284 : f32 to vector<2x13xf32>
    %286 = arith.mulf %285, %274 : vector<2x13xf32>
    %287 = arith.addf %282, %286 : vector<2x13xf32>
    %288 = arith.index_cast %arg0 : i32 to index
    %c2_76 = arith.constant 2 : index
    %289 = memref.load %arg12[%288, %c2_76] : memref<2x16xf32, #tpu.memory_space<smem>>
    %290 = vector.broadcast %289 : f32 to vector<2x13xf32>
    %291 = arith.mulf %290, %275 : vector<2x13xf32>
    %292 = arith.addf %287, %291 : vector<2x13xf32>
    %293 = arith.index_cast %arg0 : i32 to index
    %c3_77 = arith.constant 3 : index
    %294 = memref.load %arg12[%293, %c3_77] : memref<2x16xf32, #tpu.memory_space<smem>>
    %295 = vector.broadcast %294 : f32 to vector<2x13xf32>
    %296 = arith.mulf %295, %276 : vector<2x13xf32>
    %297 = arith.addf %292, %296 : vector<2x13xf32>
    %298 = arith.index_cast %arg0 : i32 to index
    %c0_78 = arith.constant 0 : index
    %299 = memref.load %arg13[%298, %c0_78] : memref<2x4xf32, #tpu.memory_space<smem>>
    %300 = vector.broadcast %299 : f32 to vector<2x13xf32>
    %301 = arith.addf %297, %300 : vector<2x13xf32>
    %302 = math.tanh %301 : vector<2x13xf32>
    %c0_79 = arith.constant 0 : index
    %c192 = arith.constant 192 : index
    %303 = vector.load %arg24[%c0_79, %c192] : memref<2x256xf32, #tpu.memory_space<vmem>>, vector<2x13xf32>
    tpu.vector_store %arg24[%c0_79, %c192], %302 {strides = array<i32>} : memref<2x256xf32, #tpu.memory_space<vmem>>, vector<2x13xf32>,
    %cst_80 = arith.constant 0.000000e+00 : f32
    %304 = vector.broadcast %cst_80 : f32 to vector<2x13xf32>
    %305 = arith.index_cast %arg0 : i32 to index
    %c4_81 = arith.constant 4 : index
    %306 = memref.load %arg12[%305, %c4_81] : memref<2x16xf32, #tpu.memory_space<smem>>
    %307 = vector.broadcast %306 : f32 to vector<2x13xf32>
    %308 = arith.mulf %307, %273 : vector<2x13xf32>
    %309 = arith.addf %304, %308 : vector<2x13xf32>
    %310 = arith.index_cast %arg0 : i32 to index
    %c5_82 = arith.constant 5 : index
    %311 = memref.load %arg12[%310, %c5_82] : memref<2x16xf32, #tpu.memory_space<smem>>
    %312 = vector.broadcast %311 : f32 to vector<2x13xf32>
    %313 = arith.mulf %312, %274 : vector<2x13xf32>
    %314 = arith.addf %309, %313 : vector<2x13xf32>
    %315 = arith.index_cast %arg0 : i32 to index
    %c6_83 = arith.constant 6 : index
    %316 = memref.load %arg12[%315, %c6_83] : memref<2x16xf32, #tpu.memory_space<smem>>
    %317 = vector.broadcast %316 : f32 to vector<2x13xf32>
    %318 = arith.mulf %317, %275 : vector<2x13xf32>
    %319 = arith.addf %314, %318 : vector<2x13xf32>
    %320 = arith.index_cast %arg0 : i32 to index
    %c7_84 = arith.constant 7 : index
    %321 = memref.load %arg12[%320, %c7_84] : memref<2x16xf32, #tpu.memory_space<smem>>
    %322 = vector.broadcast %321 : f32 to vector<2x13xf32>
    %323 = arith.mulf %322, %276 : vector<2x13xf32>
    %324 = arith.addf %319, %323 : vector<2x13xf32>
    %325 = arith.index_cast %arg0 : i32 to index
    %c1_85 = arith.constant 1 : index
    %326 = memref.load %arg13[%325, %c1_85] : memref<2x4xf32, #tpu.memory_space<smem>>
    %327 = vector.broadcast %326 : f32 to vector<2x13xf32>
    %328 = arith.addf %324, %327 : vector<2x13xf32>
    %329 = math.tanh %328 : vector<2x13xf32>
    %c0_86 = arith.constant 0 : index
    %c208 = arith.constant 208 : index
    %330 = vector.load %arg24[%c0_86, %c208] : memref<2x256xf32, #tpu.memory_space<vmem>>, vector<2x13xf32>
    tpu.vector_store %arg24[%c0_86, %c208], %329 {strides = array<i32>} : memref<2x256xf32, #tpu.memory_space<vmem>>, vector<2x13xf32>,
    %cst_87 = arith.constant 0.000000e+00 : f32
    %331 = vector.broadcast %cst_87 : f32 to vector<2x13xf32>
    %332 = arith.index_cast %arg0 : i32 to index
    %c8_88 = arith.constant 8 : index
    %333 = memref.load %arg12[%332, %c8_88] : memref<2x16xf32, #tpu.memory_space<smem>>
    %334 = vector.broadcast %333 : f32 to vector<2x13xf32>
    %335 = arith.mulf %334, %273 : vector<2x13xf32>
    %336 = arith.addf %331, %335 : vector<2x13xf32>
    %337 = arith.index_cast %arg0 : i32 to index
    %c9_89 = arith.constant 9 : index
    %338 = memref.load %arg12[%337, %c9_89] : memref<2x16xf32, #tpu.memory_space<smem>>
    %339 = vector.broadcast %338 : f32 to vector<2x13xf32>
    %340 = arith.mulf %339, %274 : vector<2x13xf32>
    %341 = arith.addf %336, %340 : vector<2x13xf32>
    %342 = arith.index_cast %arg0 : i32 to index
    %c10_90 = arith.constant 10 : index
    %343 = memref.load %arg12[%342, %c10_90] : memref<2x16xf32, #tpu.memory_space<smem>>
    %344 = vector.broadcast %343 : f32 to vector<2x13xf32>
    %345 = arith.mulf %344, %275 : vector<2x13xf32>
    %346 = arith.addf %341, %345 : vector<2x13xf32>
    %347 = arith.index_cast %arg0 : i32 to index
    %c11_91 = arith.constant 11 : index
    %348 = memref.load %arg12[%347, %c11_91] : memref<2x16xf32, #tpu.memory_space<smem>>
    %349 = vector.broadcast %348 : f32 to vector<2x13xf32>
    %350 = arith.mulf %349, %276 : vector<2x13xf32>
    %351 = arith.addf %346, %350 : vector<2x13xf32>
    %352 = arith.index_cast %arg0 : i32 to index
    %c2_92 = arith.constant 2 : index
    %353 = memref.load %arg13[%352, %c2_92] : memref<2x4xf32, #tpu.memory_space<smem>>
    %354 = vector.broadcast %353 : f32 to vector<2x13xf32>
    %355 = arith.addf %351, %354 : vector<2x13xf32>
    %356 = math.tanh %355 : vector<2x13xf32>
    %c0_93 = arith.constant 0 : index
    %c224 = arith.constant 224 : index
    %357 = vector.load %arg24[%c0_93, %c224] : memref<2x256xf32, #tpu.memory_space<vmem>>, vector<2x13xf32>
    tpu.vector_store %arg24[%c0_93, %c224], %356 {strides = array<i32>} : memref<2x256xf32, #tpu.memory_space<vmem>>, vector<2x13xf32>,
    %cst_94 = arith.constant 0.000000e+00 : f32
    %358 = vector.broadcast %cst_94 : f32 to vector<2x13xf32>
    %359 = arith.index_cast %arg0 : i32 to index
    %c12 = arith.constant 12 : index
    %360 = memref.load %arg12[%359, %c12] : memref<2x16xf32, #tpu.memory_space<smem>>
    %361 = vector.broadcast %360 : f32 to vector<2x13xf32>
    %362 = arith.mulf %361, %273 : vector<2x13xf32>
    %363 = arith.addf %358, %362 : vector<2x13xf32>
    %364 = arith.index_cast %arg0 : i32 to index
    %c13 = arith.constant 13 : index
    %365 = memref.load %arg12[%364, %c13] : memref<2x16xf32, #tpu.memory_space<smem>>
    %366 = vector.broadcast %365 : f32 to vector<2x13xf32>
    %367 = arith.mulf %366, %274 : vector<2x13xf32>
    %368 = arith.addf %363, %367 : vector<2x13xf32>
    %369 = arith.index_cast %arg0 : i32 to index
    %c14 = arith.constant 14 : index
    %370 = memref.load %arg12[%369, %c14] : memref<2x16xf32, #tpu.memory_space<smem>>
    %371 = vector.broadcast %370 : f32 to vector<2x13xf32>
    %372 = arith.mulf %371, %275 : vector<2x13xf32>
    %373 = arith.addf %368, %372 : vector<2x13xf32>
    %374 = arith.index_cast %arg0 : i32 to index
    %c15 = arith.constant 15 : index
    %375 = memref.load %arg12[%374, %c15] : memref<2x16xf32, #tpu.memory_space<smem>>
    %376 = vector.broadcast %375 : f32 to vector<2x13xf32>
    %377 = arith.mulf %376, %276 : vector<2x13xf32>
    %378 = arith.addf %373, %377 : vector<2x13xf32>
    %379 = arith.index_cast %arg0 : i32 to index
    %c3_95 = arith.constant 3 : index
    %380 = memref.load %arg13[%379, %c3_95] : memref<2x4xf32, #tpu.memory_space<smem>>
    %381 = vector.broadcast %380 : f32 to vector<2x13xf32>
    %382 = arith.addf %378, %381 : vector<2x13xf32>
    %383 = math.tanh %382 : vector<2x13xf32>
    %c0_96 = arith.constant 0 : index
    %c240 = arith.constant 240 : index
    %384 = vector.load %arg24[%c0_96, %c240] : memref<2x256xf32, #tpu.memory_space<vmem>>, vector<2x13xf32>
    tpu.vector_store %arg24[%c0_96, %c240], %383 {strides = array<i32>} : memref<2x256xf32, #tpu.memory_space<vmem>>, vector<2x13xf32>,
    %c0_97 = arith.constant 0 : index
    %c0_98 = arith.constant 0 : index
    %385 = vector.load %arg24[%c0_97, %c0_98] : memref<2x256xf32, #tpu.memory_space<vmem>>, vector<2x256xf32>
    %c0_99 = arith.constant 0 : index
    %c0_100 = arith.constant 0 : index
    %c0_101 = arith.constant 0 : index
    %386 = vector.load %arg14[%c0_99, %c0_100, %c0_101] : memref<1x256x128xf32, #tpu.memory_space<vmem>>, vector<1x256x128xf32>
    %387 = vector.shape_cast %386 : vector<1x256x128xf32> to vector<256x128xf32>
    %cst_102 = arith.constant dense<0.000000e+00> : vector<2x128xf32>
    %388 = tpu.matmul %385, %387, %cst_102 {dimension_numbers = #tpu.dot_dimension_numbers<[1], [0], [0], [1], [0, 0, 1, 1], [], []>} : vector<2x256xf32>, vector<256x128xf32>, vector<2x128xf32> -> vector<2x128xf32>
    %c0_103 = arith.constant 0 : index
    %c0_104 = arith.constant 0 : index
    %c0_105 = arith.constant 0 : index
    %389 = vector.load %arg15[%c0_103, %c0_104, %c0_105] : memref<1x1x128xf32, #tpu.memory_space<vmem>>, vector<1x1x128xf32>
    %390 = vector.shape_cast %389 : vector<1x1x128xf32> to vector<1x128xf32>
    %391 = vector.broadcast %390 : vector<1x128xf32> to vector<2x128xf32>
    %392 = arith.addf %388, %391 : vector<2x128xf32>
    %cst_106 = arith.constant 0.000000e+00 : f32
    %393 = vector.broadcast %cst_106 : f32 to vector<2x128xf32>
    %394 = arith.maximumf %392, %393 : vector<2x128xf32>
    %c0_107 = arith.constant 0 : index
    %c0_108 = arith.constant 0 : index
    %c0_109 = arith.constant 0 : index
    %395 = vector.load %arg16[%c0_107, %c0_108, %c0_109] : memref<1x128x32xf32, #tpu.memory_space<vmem>>, vector<1x128x32xf32>
    %396 = vector.shape_cast %395 : vector<1x128x32xf32> to vector<128x32xf32>
    %cst_110 = arith.constant dense<0.000000e+00> : vector<2x32xf32>
    %397 = tpu.matmul %394, %396, %cst_110 {dimension_numbers = #tpu.dot_dimension_numbers<[1], [0], [0], [1], [0, 0, 1, 1], [], []>} : vector<2x128xf32>, vector<128x32xf32>, vector<2x32xf32> -> vector<2x32xf32>
    %c0_111 = arith.constant 0 : index
    %c0_112 = arith.constant 0 : index
    %c0_113 = arith.constant 0 : index
    %398 = vector.load %arg17[%c0_111, %c0_112, %c0_113] : memref<1x1x32xf32, #tpu.memory_space<vmem>>, vector<1x1x32xf32>
    %399 = vector.shape_cast %398 : vector<1x1x32xf32> to vector<1x32xf32>
    %400 = vector.broadcast %399 : vector<1x32xf32> to vector<2x32xf32>
    %401 = arith.addf %397, %400 : vector<2x32xf32>
    %c0_114 = arith.constant 0 : index
    %c0_115 = arith.constant 0 : index
    %402 = vector.load %arg18[%c0_114, %c0_115] : memref<32x32xf32, #tpu.memory_space<vmem>>, vector<32x32xf32>
    %cst_116 = arith.constant dense<0.000000e+00> : vector<2x32xf32>
    %403 = tpu.matmul %401, %402, %cst_116 {dimension_numbers = #tpu.dot_dimension_numbers<[1], [0], [0], [1], [0, 0, 1, 1], [], []>} : vector<2x32xf32>, vector<32x32xf32>, vector<2x32xf32> -> vector<2x32xf32>
    %c0_117 = arith.constant 0 : index
    %c0_118 = arith.constant 0 : index
    %404 = vector.load %arg19[%c0_117, %c0_118] : memref<1x32xf32, #tpu.memory_space<vmem>>, vector<1x32xf32>
    %405 = vector.broadcast %404 : vector<1x32xf32> to vector<2x32xf32>
    %406 = arith.addf %403, %405 : vector<2x32xf32>
    %cst_119 = arith.constant 0.000000e+00 : f32
    %407 = vector.broadcast %cst_119 : f32 to vector<2x32xf32>
    %408 = arith.maximumf %406, %407 : vector<2x32xf32>
    %c0_120 = arith.constant 0 : index
    %c0_121 = arith.constant 0 : index
    %409 = vector.load %arg20[%c0_120, %c0_121] : memref<32x8xf32, #tpu.memory_space<vmem>>, vector<32x8xf32>
    %cst_122 = arith.constant dense<0.000000e+00> : vector<2x8xf32>
    %410 = tpu.matmul %408, %409, %cst_122 {dimension_numbers = #tpu.dot_dimension_numbers<[1], [0], [0], [1], [0, 0, 1, 1], [], []>} : vector<2x32xf32>, vector<32x8xf32>, vector<2x8xf32> -> vector<2x8xf32>
    %c0_123 = arith.constant 0 : index
    %c0_124 = arith.constant 0 : index
    %411 = vector.load %arg21[%c0_123, %c0_124] : memref<1x8xf32, #tpu.memory_space<vmem>>, vector<1x8xf32>
    %412 = vector.broadcast %411 : vector<1x8xf32> to vector<2x8xf32>
    %413 = arith.addf %410, %412 : vector<2x8xf32>
    %c0_125 = arith.constant 0 : index
    %c0_126 = arith.constant 0 : index
    %c0_127 = arith.constant 0 : index
    %414 = vector.load %arg22[%c0_125, %c0_126, %c0_127] : memref<1x2x8xf32, #tpu.memory_space<vmem>>, vector<1x2x8xf32>
    %415 = vector.shape_cast %414 : vector<1x2x8xf32> to vector<2x8xf32>
    %416 = vector.shape_cast %413 : vector<2x8xf32> to vector<1x2x8xf32>
    tpu.vector_store %arg22[%c0_125, %c0_126, %c0_127], %416 {strides = array<i32>} : memref<1x2x8xf32, #tpu.memory_space<vmem>>, vector<1x2x8xf32>,
    return
  }
  func.func @transform_0(%arg0: i32) -> (i32, i32, i32) {
    %c0_i32 = arith.constant 0 : i32
    %c0_i32_0 = arith.constant 0 : i32
    %c0_i32_1 = arith.constant 0 : i32
    return %arg0, %c0_i32, %c0_i32_0 : i32, i32, i32
  }
  func.func @transform_1(%arg0: i32) -> (i32, i32) {
    %c0_i32 = arith.constant 0 : i32
    %c0_i32_0 = arith.constant 0 : i32
    %c0_i32_1 = arith.constant 0 : i32
    return %c0_i32, %c0_i32_0 : i32, i32
  }
  func.func @transform_2(%arg0: i32) -> (i32, i32) {
    %c0_i32 = arith.constant 0 : i32
    %c0_i32_0 = arith.constant 0 : i32
    %c0_i32_1 = arith.constant 0 : i32
    return %c0_i32, %c0_i32_0 : i32, i32
  }
  func.func @transform_3(%arg0: i32) -> (i32, i32) {
    %c0_i32 = arith.constant 0 : i32
    %c0_i32_0 = arith.constant 0 : i32
    %c0_i32_1 = arith.constant 0 : i32
    return %c0_i32, %c0_i32_0 : i32, i32
  }
  func.func @transform_4(%arg0: i32) -> (i32, i32) {
    %c0_i32 = arith.constant 0 : i32
    %c0_i32_0 = arith.constant 0 : i32
    %c0_i32_1 = arith.constant 0 : i32
    return %c0_i32, %c0_i32_0 : i32, i32
  }
  func.func @transform_5(%arg0: i32) -> (i32, i32, i32) {
    %c0_i32 = arith.constant 0 : i32
    %c0_i32_0 = arith.constant 0 : i32
    %c0_i32_1 = arith.constant 0 : i32
    return %arg0, %c0_i32, %c0_i32_0 : i32, i32, i32
  }
  func.func @transform_6(%arg0: i32) -> (i32, i32) {
    %c0_i32 = arith.constant 0 : i32
    %c0_i32_0 = arith.constant 0 : i32
    %c0_i32_1 = arith.constant 0 : i32
    return %c0_i32, %c0_i32_0 : i32, i32
  }
  func.func @transform_7(%arg0: i32) -> (i32, i32) {
    %c0_i32 = arith.constant 0 : i32
    %c0_i32_0 = arith.constant 0 : i32
    %c0_i32_1 = arith.constant 0 : i32
    return %c0_i32, %c0_i32_0 : i32, i32
  }
  func.func @transform_8(%arg0: i32) -> (i32, i32) {
    %c0_i32 = arith.constant 0 : i32
    %c0_i32_0 = arith.constant 0 : i32
    %c0_i32_1 = arith.constant 0 : i32
    return %c0_i32, %c0_i32_0 : i32, i32
  }
  func.func @transform_9(%arg0: i32) -> (i32, i32) {
    %c0_i32 = arith.constant 0 : i32
    %c0_i32_0 = arith.constant 0 : i32
    %c0_i32_1 = arith.constant 0 : i32
    return %c0_i32, %c0_i32_0 : i32, i32
  }
  func.func @transform_10(%arg0: i32) -> (i32, i32) {
    %c0_i32 = arith.constant 0 : i32
    %c0_i32_0 = arith.constant 0 : i32
    %c0_i32_1 = arith.constant 0 : i32
    return %c0_i32, %c0_i32_0 : i32, i32
  }
  func.func @transform_11(%arg0: i32) -> (i32, i32) {
    %c0_i32 = arith.constant 0 : i32
    %c0_i32_0 = arith.constant 0 : i32
    %c0_i32_1 = arith.constant 0 : i32
    return %c0_i32, %c0_i32_0 : i32, i32
  }
  func.func @transform_12(%arg0: i32) -> (i32, i32) {
    %c0_i32 = arith.constant 0 : i32
    %c0_i32_0 = arith.constant 0 : i32
    %c0_i32_1 = arith.constant 0 : i32
    return %c0_i32, %c0_i32_0 : i32, i32
  }
  func.func @transform_13(%arg0: i32) -> (i32, i32, i32) {
    %c0_i32 = arith.constant 0 : i32
    %c0_i32_0 = arith.constant 0 : i32
    %c0_i32_1 = arith.constant 0 : i32
    return %arg0, %c0_i32, %c0_i32_0 : i32, i32, i32
  }
  func.func @transform_14(%arg0: i32) -> (i32, i32, i32) {
    %c0_i32 = arith.constant 0 : i32
    %c0_i32_0 = arith.constant 0 : i32
    %c0_i32_1 = arith.constant 0 : i32
    return %arg0, %c0_i32, %c0_i32_0 : i32, i32, i32
  }
  func.func @transform_15(%arg0: i32) -> (i32, i32, i32) {
    %c0_i32 = arith.constant 0 : i32
    %c0_i32_0 = arith.constant 0 : i32
    %c0_i32_1 = arith.constant 0 : i32
    return %arg0, %c0_i32, %c0_i32_0 : i32, i32, i32
  }
  func.func @transform_16(%arg0: i32) -> (i32, i32, i32) {
    %c0_i32 = arith.constant 0 : i32
    %c0_i32_0 = arith.constant 0 : i32
    %c0_i32_1 = arith.constant 0 : i32
    return %arg0, %c0_i32, %c0_i32_0 : i32, i32, i32
  }
  func.func @transform_17(%arg0: i32) -> (i32, i32) {
    %c0_i32 = arith.constant 0 : i32
    %c0_i32_0 = arith.constant 0 : i32
    %c0_i32_1 = arith.constant 0 : i32
    return %c0_i32, %c0_i32_0 : i32, i32
  }
  func.func @transform_18(%arg0: i32) -> (i32, i32) {
    %c0_i32 = arith.constant 0 : i32
    %c0_i32_0 = arith.constant 0 : i32
    %c0_i32_1 = arith.constant 0 : i32
    return %c0_i32, %c0_i32_0 : i32, i32
  }
  func.func @transform_19(%arg0: i32) -> (i32, i32) {
    %c0_i32 = arith.constant 0 : i32
    %c0_i32_0 = arith.constant 0 : i32
    %c0_i32_1 = arith.constant 0 : i32
    return %c0_i32, %c0_i32_0 : i32, i32
  }
  func.func @transform_20(%arg0: i32) -> (i32, i32) {
    %c0_i32 = arith.constant 0 : i32
    %c0_i32_0 = arith.constant 0 : i32
    %c0_i32_1 = arith.constant 0 : i32
    return %c0_i32, %c0_i32_0 : i32, i32
  }
  func.func @transform_21(%arg0: i32) -> (i32, i32, i32) {
    %c0_i32 = arith.constant 0 : i32
    %c0_i32_0 = arith.constant 0 : i32
    %c0_i32_1 = arith.constant 0 : i32
    return %arg0, %c0_i32, %c0_i32_0 : i32, i32, i32
  }
}

</mosaic_0001>

<bundles_post_ra>
// kernel: vanra_vrl_forward.1
= control target key start
LH: loop header
LB: loop body
LE: loop exit
PB: predicated region body
PF: predicated region fallthrough
CT: control target
= control target key end

     0   :  { %s3614_s0 = inlined_call_operand.vmem [shape: f32[2,2,16], index: 0, kind: input, shape index: {}]   ;;  %s3615_s1 = inlined_call_operand.vmem [shape: f32[2,5], index: 1, kind: input, shape index: {}]   ;;  %s3616_s2 = inlined_call_operand.vmem [shape: f32[2,1], index: 2, kind: input, shape index: {}]   ;;  %s3617_s3 = inlined_call_operand.vmem [shape: f32[2,4], index: 3, kind: input, shape index: {}]   ;;  %s3618_s4 = inlined_call_operand.vmem [shape: f32[2,4], index: 4, kind: input, shape index: {}]   ;;  %s3619_s5 = inlined_call_operand.vmem [shape: f32[2,1,16], index: 5, kind: input, shape index: {}]   ;;  %s3620_s6 = inlined_call_operand.vmem [shape: f32[2,1], index: 6, kind: input, shape index: {}]   ;;  %s3621_s7 = inlined_call_operand.vmem [shape: f32[2,8], index: 7, kind: input, shape index: {}]   ;;  %s3622_s8 = inlined_call_operand.vmem [shape: f32[2,4], index: 8, kind: input, shape index: {}]   ;;  %s3623_s9 = inlined_call_operand.vmem [shape: f32[2,12], index: 9, kind: input, shape index: {}]   ;;  %s3624_s10 = inlined_call_operand.vmem [shape: f32[2,4], index: 10, kind: input, shape index: {}]   ;;  %s3625_s11 = inlined_call_operand.vmem [shape: f32[2,16], index: 11, kind: input, shape index: {}]   ;;  %s3626_s12 = inlined_call_operand.vmem [shape: f32[2,4], index: 12, kind: input, shape index: {}]   ;;  %s3627_s13 = inlined_call_operand.hbm [shape: f32[2,256,128], index: 13, kind: input, shape index: {}]   ;;  %s3628_s14 = inlined_call_operand.vmem [shape: f32[2,1,128], index: 14, kind: input, shape index: {}]   ;;  %s3629_s15 = inlined_call_operand.vmem [shape: f32[2,128,32], index: 15, kind: input, shape index: {}]   ;;  %s3630_s16 = inlined_call_operand.vmem [shape: f32[2,1,32], index: 16, kind: input, shape index: {}]   ;;  %s3631_s17 = inlined_call_operand.vmem [shape: f32[32,32], index: 17, kind: input, shape index: {}]   ;;  %s3632_s18 = inlined_call_operand.vmem [shape: f32[1,32], index: 18, kind: input, shape index: {}]   ;;  %s3633_s19 = inlined_call_operand.vmem [shape: f32[32,8], index: 19, kind: input, shape index: {}]   ;;  %s3634_s20 = inlined_call_operand.vmem [shape: f32[1,8], index: 20, kind: input, shape index: {}]   ;;  %s3635_s21 = inlined_call_operand.vmem [shape: f32[2,2,8], index: 21, kind: output, shape index: {}]  }
   0x1   :  { %3650 = sst [smem:[#allocation34_spill]] %s3614_s0 }
   0x2   :  { %3651 = sst [smem:[#allocation35_spill]] %s3615_s1 }
   0x3   :  { %3652 = sst [smem:[#allocation36_spill]] %s3616_s2 }
   0x4   :  { %3653 = sst [smem:[#allocation37_spill]] %s3617_s3 }
   0x5   :  { %3654 = sst [smem:[#allocation38_spill]] %s3618_s4 }
   0x6   :  { %3655 = sst [smem:[#allocation39_spill]] %s3619_s5 }
   0x7   :  { %3656 = sst [smem:[#allocation40_spill]] %s3620_s6 }
   0x8   :  { %3657 = sst [smem:[#allocation41_spill]] %s3621_s7 }
   0x9   :  { %3658 = sst [smem:[#allocation42_spill]] %s3622_s8 }
   0xa   :  { %3659 = sst [smem:[#allocation43_spill]] %s3623_s9 }
   0xb   :  { %3660 = sst [smem:[#allocation44_spill]] %s3624_s10 }
   0xc   :  { %3661 = sst [smem:[#allocation45_spill]] %s3625_s11 }
   0xd   :  { %3662 = sst [smem:[#allocation46_spill]] %s3626_s12 }
   0xe   :  { %3663 = sst [smem:[#allocation47_spill]] %s3627_s13 }
   0xf   :  { %3664 = sst [smem:[#allocation48_spill]] %s3634_s20 }
  0x10   :  { %3665 = sst [smem:[#allocation49_spill]] %s3635_s21 }
  0x11   :  { %26 = vsyncpa [#allocation6], 0 }
  0x12   :  { %27 = vsyncpa [#allocation8], 0 }
  0x13   :  { %28 = vsyncpa [#allocation11], 0 }
  0x14   :  { %29 = vsyncpa [#allocation14], 0 }
  0x15   :  { %30 = vsyncpa [#allocation17], 0 }
  0x16   :  { %31 = vsyncpa [#allocation20], 0 }
  0x17   :  { %32 = vsyncpa [#allocation5], 0 }
  0x18   :  { %34 = vsyncpa [#allocation5 + $0x1], 0  ;;  %s2940_s2 = smov 0   ;;  %s2942_s25 = smov 0  }
  0x19   :  { %s2944_s26 = smov 0   ;;  %s2946_s27 = smov 0  }
  0x1a LB: > { %3666 = sst [smem:[#allocation30_spill]] %s2790_s25  ;;  %s3668_s29 = sld [smem:[#allocation36_spill]]  ;;  %s2798_s27 = sphi %s2946_s27, %s3710_s27   ;;  %s2794_s26 = sphi %s2944_s26, %s3713_s26   ;;  %s2790_s25 = sphi %s2942_s25, %s3712_s25   ;;  %s2786_s2 = sphi %s2940_s2, %s3711_s2  }
  0x1b   : > { %3667 = sst [smem:[#allocation31_spill]] %s2794_s26  ;;  %s2964_s4 = sadd.s32 4294967295, %s2798_s27  }
  0x1c   : > { %p2104_p0 = scmp.ge.s32.totalorder %s2798_s27, 1  ;;  %p3636_p1 = scmp.eq.s32.totalorder %s2964_s4, 0 }
  0x1d   : > { %p542_p2 = scmp.lt.s32.totalorder %s2798_s27, 3  ;;  %s3670_s23 = sld [smem:[#allocation38_spill]] }
  0x1e   : > { %s3671_s7 = sld [smem:[#allocation41_spill]]  ;;  %s3673_s9 = sld [smem:[#allocation43_spill]] }
  0x1f   : > { %p2969_p3 = pnand %p2104_p0, %p542_p2 }
  0x20   : > { %s566_s0 = sshll.u32 %s3668_s29, 4  ;;  %s567_s0 = int_to_ptr.vmem [resolvable:$true] %s566_s0 }
  0x21   : > { %s3669_s30 = scalar_select %p2969_p3, 1, 0 }
  0x22   : > { %p2383_p4 = pneg %p2969_p3  ;;  %s2545_s22 = scalar_lea.vmem %s567_s0, 32 }
  0x23   : > { %s588_s1 = sshll.u32 %s3670_s23, 4  ;;  %p2546_p6 = scmp.ne.s32.totalorder %s567_s0, %s2545_s22  ;;  %s589_s1 = int_to_ptr.vmem [resolvable:$true] %s588_s1 }
  0x24   : > { %s610_s28 = sshll.u32 %s3671_s7, 4  ;;  %p2983_p5 = pnand %p2383_p4, %p3636_p1  ;;  %s2987_s28 = int_to_ptr.vmem [resolvable:$true] %s610_s28 }
  0x25   : > { %s632_s5 = sshll.u32 %s3673_s9, 4  ;;  %p2553_p10 = scmp.lt.s32.totalorder %s567_s0, %s567_s0  ;;  %s2992_s5 = int_to_ptr.vmem [resolvable:$true] %s632_s5 }
  0x26   : > { %p2996_p7 = pneg %p2983_p5  ;;  %p2554_p11 = scmp.lt.s32.totalorder %s2545_s22, %s2545_s22 }
  0x28   : > { %p2548_p8 = pnand %p2996_p7, %p2546_p6  ;;  %p2555_p12 = por %p2554_p11, %p2553_p10 }
  0x2a   : > { %p2549_p9 = pneg %p2548_p8 }
  0x2c   : > { %p2556_p13 = pnand %p2555_p12, %p2549_p9 }
  0x2e   : > { %2559 = shalt.err (!%p2556_p13)
}
  0x2f   : > { %s2800_s20 = smov [#allocation7]   ;;  %s2560_s21 = scalar_lea.vmem %s589_s1, 32 }
  0x30   : > { %2389 = dma.vmem_to_smem (!%p2983_p5), %s567_s0, 32, %s2800_s20, [#allocation8]  }
  0x31   : > { %p2561_p0 = scmp.ne.s32.totalorder %s589_s1, %s2560_s21  ;;  %p2568_p1 = scmp.lt.s32.totalorder %s589_s1, %s589_s1 }
  0x32   : > { %p2569_p3 = scmp.lt.s32.totalorder %s2560_s21, %s2560_s21 }
  0x33   : > { %p2563_p2 = pnand %p2561_p0, %p2996_p7 }
  0x34   : > { %p2570_p6 = por %p2569_p3, %p2568_p1 }
  0x35   : > { %p2564_p4 = pneg %p2563_p2 }
  0x37   : > { %p2571_p8 = pnand %p2570_p6, %p2564_p4 }
  0x39   : > { %2574 = shalt.err (!%p2571_p8)
}
  0x3a   : > { %s2801_s24 = smov [#allocation10]   ;;  %s2575_s3 = scalar_lea.vmem %s2987_s28, 32 }
  0x3b   : > { %2395 = dma.vmem_to_smem (!%p2983_p5), %s589_s1, 32, %s2801_s24, [#allocation11]  }
  0x3c   : > { %p2576_p9 = scmp.ne.s32.totalorder %s2987_s28, %s2575_s3  ;;  %p2583_p12 = scmp.lt.s32.totalorder %s2987_s28, %s2987_s28 }
  0x3d   : > { %p2584_p13 = scmp.lt.s32.totalorder %s2575_s3, %s2575_s3 }
  0x3e   : > { %p2578_p10 = pnand %p2576_p9, %p2996_p7 }
  0x3f   : > { %p2585_p0 = por %p2584_p13, %p2583_p12 }
  0x40   : > { %p2579_p11 = pneg %p2578_p10 }
  0x42   : > { %p2586_p1 = pnand %p2585_p0, %p2579_p11 }
  0x44   : > { %2589 = shalt.err (!%p2586_p1)
}
  0x45   : > { %s2802_s0 = smov [#allocation13]   ;;  %s2590_s1 = scalar_lea.vmem %s2992_s5, 32 }
  0x46   : > { %2401 = dma.vmem_to_smem (!%p2983_p5), %s2987_s28, 32, %s2802_s0, [#allocation14]  }
  0x47   : > { %p2591_p3 = scmp.ne.s32.totalorder %s2992_s5, %s2590_s1  ;;  %p2598_p6 = scmp.lt.s32.totalorder %s2992_s5, %s2992_s5 }
  0x48   : > { %p2599_p8 = scmp.lt.s32.totalorder %s2590_s1, %s2590_s1 }
  0x49   : > { %p2593_p2 = pnand %p2591_p3, %p2996_p7 }
  0x4a   : > { %p2600_p9 = por %p2599_p8, %p2598_p6 }
  0x4b   : > { %p2594_p4 = pneg %p2593_p2 }
  0x4d   : > { %p2601_p10 = pnand %p2600_p9, %p2594_p4 }
  0x4f   : > { %2604 = shalt.err (!%p2601_p10)
}
  0x50   : > { %s2803_s22 = smov [#allocation16]   ;;  %s3675_s11 = sld [smem:[#allocation45_spill]] }
  0x51   : > { %2407 = dma.vmem_to_smem (!%p2983_p5), %s2992_s5, 32, %s2803_s22, [#allocation17]  }
  0x52   : > { %s3676_s0 = sld [smem:[#allocation35_spill]] }
  0x56   : > { %s654_s28 = sshll.u32 %s3675_s11, 4  ;;  %s655_s28 = int_to_ptr.vmem [resolvable:$true] %s654_s28 }
  0x57   : > { %s2605_s9 = scalar_lea.vmem %s655_s28, 32  ;;  %p2613_p0 = scmp.lt.s32.totalorder %s655_s28, %s655_s28 }
  0x58   : > { %s555_s7 = sshll.u32 %s3676_s0, 4  ;;  %p2606_p11 = scmp.ne.s32.totalorder %s655_s28, %s2605_s9  ;;  %s556_s7 = int_to_ptr.vmem [resolvable:$true] %s555_s7 }
  0x59   : > { %p2614_p1 = scmp.lt.s32.totalorder %s2605_s9, %s2605_s9 }
  0x5a   : > { %p2608_p12 = pnand %p2606_p11, %p2996_p7 }
  0x5b   : > { %p2615_p3 = por %p2614_p1, %p2613_p0 }
  0x5c   : > { %p2609_p13 = pneg %p2608_p12 }
  0x5e   : > { %p2616_p2 = pnand %p2615_p3, %p2609_p13 }
  0x60   : > { %2619 = shalt.err (!%p2616_p2)
}
  0x61   : > { %s2804_s5 = smov [#allocation19]   ;;  %s2620_s1 = scalar_lea.vmem %s556_s7, 32 }
  0x62   : > { %2413 = dma.vmem_to_smem (!%p2983_p5), %s655_s28, 32, %s2804_s5, [#allocation20]  }
  0x63   : > { %p2621_p4 = scmp.ne.s32.totalorder %s556_s7, %s2620_s1  ;;  %p2628_p9 = scmp.lt.s32.totalorder %s556_s7, %s556_s7 }
  0x64   : > { %p2629_p10 = scmp.lt.s32.totalorder %s2620_s1, %s2620_s1 }
  0x65   : > { %p2623_p6 = pnand %p2621_p4, %p2996_p7 }
  0x66   : > { %p2630_p11 = por %p2629_p10, %p2628_p9 }
  0x67   : > { %p2624_p8 = pneg %p2623_p6 }
  0x69   : > { %p2631_p12 = pnand %p2630_p11, %p2624_p8 }
  0x6b   : > { %2634 = shalt.err (!%p2631_p12)
}
  0x6c   : > { %s2805_s9 = smov [#allocation4]   ;;  %s3677_s21 = sld [smem:[#allocation37_spill]] }
  0x6d   : > { %2386 = dma.vmem_to_smem (!%p2983_p5), %s556_s7, 32, %s2805_s9, [#allocation6]  }
  0x6e   : > { %s3678_s6 = sld [smem:[#allocation40_spill]] }
  0x72   : > { %s577_s28 = sshll.u32 %s3677_s21, 4  ;;  %s578_s28 = int_to_ptr.vmem [resolvable:$true] %s577_s28 }
  0x73   : > { %s2635_s5 = scalar_lea.vmem %s578_s28, 32  ;;  %p2643_p3 = scmp.lt.s32.totalorder %s578_s28, %s578_s28 }
  0x74   : > { %s599_s0 = sshll.u32 %s3678_s6, 4  ;;  %p2636_p13 = scmp.ne.s32.totalorder %s578_s28, %s2635_s5  ;;  %s600_s0 = int_to_ptr.vmem [resolvable:$true] %s599_s0 }
  0x75   : > { %p2644_p2 = scmp.lt.s32.totalorder %s2635_s5, %s2635_s5 }
  0x76   : > { %p2638_p0 = pnand %p2636_p13, %p2996_p7 }
  0x77   : > { %p2645_p4 = por %p2644_p2, %p2643_p3 }
  0x78   : > { %p2639_p1 = pneg %p2638_p0 }
  0x7a   : > { %p2646_p6 = pnand %p2645_p4, %p2639_p1 }
  0x7c   : > { %2649 = shalt.err (!%p2646_p6)
}
  0x7d   : > { %s2806_s7 = smov [#allocation9]   ;;  %s2650_s1 = scalar_lea.vmem %s600_s0, 32 }
  0x7e   : > { %2392 = dma.vmem_to_smem (!%p2983_p5), %s578_s28, 32, %s2806_s7, [#allocation8]  }
  0x7f   : > { %p2651_p8 = scmp.ne.s32.totalorder %s600_s0, %s2650_s1  ;;  %p2658_p11 = scmp.lt.s32.totalorder %s600_s0, %s600_s0 }
  0x80   : > { %p2659_p12 = scmp.lt.s32.totalorder %s2650_s1, %s2650_s1 }
  0x81   : > { %p2653_p9 = pnand %p2651_p8, %p2996_p7 }
  0x82   : > { %p2660_p13 = por %p2659_p12, %p2658_p11 }
  0x83   : > { %p2654_p10 = pneg %p2653_p9 }
  0x85   : > { %p2661_p0 = pnand %p2660_p13, %p2654_p10 }
  0x87   : > { %2664 = shalt.err (!%p2661_p0)
}
  0x88   : > { %s2807_s9 = smov [#allocation12]   ;;  %s3679_s8 = sld [smem:[#allocation42_spill]] }
  0x89   : > { %2398 = dma.vmem_to_smem (!%p2983_p5), %s600_s0, 32, %s2807_s9, [#allocation11]  }
  0x8a   : > { %s3680_s10 = sld [smem:[#allocation44_spill]] }
  0x8e   : > { %s621_s21 = sshll.u32 %s3679_s8, 4  ;;  %s622_s21 = int_to_ptr.vmem [resolvable:$true] %s621_s21 }
  0x8f   : > { %s2665_s5 = scalar_lea.vmem %s622_s21, 32  ;;  %p2673_p4 = scmp.lt.s32.totalorder %s622_s21, %s622_s21 }
  0x90   : > { %s643_s3 = sshll.u32 %s3680_s10, 4  ;;  %p2666_p1 = scmp.ne.s32.totalorder %s622_s21, %s2665_s5  ;;  %s644_s3 = int_to_ptr.vmem [resolvable:$true] %s643_s3 }
  0x91   : > { %p2674_p6 = scmp.lt.s32.totalorder %s2665_s5, %s2665_s5 }
  0x92   : > { %p2668_p3 = pnand %p2666_p1, %p2996_p7 }
  0x93   : > { %p2675_p8 = por %p2674_p6, %p2673_p4 }
  0x94   : > { %p2669_p2 = pneg %p2668_p3 }
  0x96   : > { %p2676_p9 = pnand %p2675_p8, %p2669_p2 }
  0x98   : > { %2679 = shalt.err (!%p2676_p9)
}
  0x99   : > { %s2808_s0 = smov [#allocation15]   ;;  %s2680_s7 = scalar_lea.vmem %s644_s3, 32 }
  0x9a   : > { %2404 = dma.vmem_to_smem (!%p2983_p5), %s622_s21, 32, %s2808_s0, [#allocation14]  }
  0x9b   : > { %p2681_p10 = scmp.ne.s32.totalorder %s644_s3, %s2680_s7  ;;  %p2688_p13 = scmp.lt.s32.totalorder %s644_s3, %s644_s3 }
  0x9c   : > { %p2689_p0 = scmp.lt.s32.totalorder %s2680_s7, %s2680_s7 }
  0x9d   : > { %p2683_p11 = pnand %p2681_p10, %p2996_p7 }
  0x9e   : > { %p2690_p1 = por %p2689_p0, %p2688_p13 }
  0x9f   : > { %p2684_p12 = pneg %p2683_p11 }
  0xa1   : > { %p2691_p3 = pnand %p2690_p1, %p2684_p12 }
  0xa3   : > { %2694 = shalt.err (!%p2691_p3)
}
  0xa4   : > { %s2809_s1 = smov [#allocation18]   ;;  %s3681_s12 = sld [smem:[#allocation46_spill]] }
  0xa5   : > { %2410 = dma.vmem_to_smem (!%p2983_p5), %s644_s3, 32, %s2809_s1, [#allocation17]  }
  0xaa   : > { %s665_s20 = sshll.u32 %s3681_s12, 4  ;;  %s666_s20 = int_to_ptr.vmem [resolvable:$true] %s665_s20 }
  0xab   : > { %s2695_s21 = scalar_lea.vmem %s666_s20, 32  ;;  %p2703_p8 = scmp.lt.s32.totalorder %s666_s20, %s666_s20 }
  0xac   : > { %p2696_p2 = scmp.ne.s32.totalorder %s666_s20, %s2695_s21  ;;  %p2704_p9 = scmp.lt.s32.totalorder %s2695_s21, %s2695_s21 }
  0xae   : > { %p2698_p4 = pnand %p2696_p2, %p2996_p7  ;;  %p2705_p10 = por %p2704_p9, %p2703_p8 }
  0xb0   : > { %p2699_p6 = pneg %p2698_p4 }
  0xb2   : > { %p2706_p11 = pnand %p2705_p10, %p2699_p6 }
  0xb4   : > { %2709 = shalt.err (!%p2706_p11)
}
  0xb5   : > { %s2810_s28 = smov [#allocation21]   ;;  %s3076_s23 = sadd.s32 1, %s2798_s27  }
  0xb6   : > { %2416 = dma.vmem_to_smem (!%p2983_p5), %s666_s20, 32, %s2810_s28, [#allocation20]  }
  0xb7   : > { %3682 = sst [smem:[#allocation32_spill]] %s3076_s23  ;;  %s327_s24 = ssub.s32 %s2798_s27, %s3076_s23 }
  0xb8   : > { %s330_s3 = sadd.s32 1, %s2794_s26  ;;  %p328_p7 = scmp.eq.s32.totalorder %s327_s24, 0 }
  0xb9   : > { %p337_p12 = scmp.ne.s32.totalorder %s2794_s26, %s2790_s25  ;;  %p338_p13 = scmp.eq.s32.totalorder %s2798_s27, 0 }
  0xba   : > { %p343_p0 = scmp.ne.s32.totalorder %s2790_s25, %s2786_s2  ;;  %p3684_p3 = scmp.eq.s32.totalorder %s2964_s4, 0 }
  0xbb   : > { %s3087_s29 = scalar_select %p328_p7, %s2794_s26, %s330_s3  }
  0xbc   : > { %p339_p1 = por %p338_p13, %p337_p12  ;;  %p3091_p2 = por %p3684_p3, %p343_p0 }
  0xbd   : > { %3683 = sst [smem:[#allocation33_spill]] %s3087_s29  ;;  %p2432_p4 = scmp.lt.s32.totalorder %s2798_s27, 2 }
  0xbe   : > { %s701_s0 = sand.u32 1, %s2794_s26   ;;  %s2148_s1 = sshll.u32 %s2798_s27, 12 }
  0xbf   : > { %s2117_s7 = sshll.u32 %s701_s0, 8  ;;  %s3686_s13 = sld [smem:[#allocation47_spill]] }
  0xc0   : > { %s705_s2 = scalar_lea.vmem [#allocation22], %s2117_s7  ;;  %p3105_p5 = pnand %p2432_p4, %p339_p1 }
  0xc1   : > { %s712_s21 = sshll.u32 %s705_s2, 4  ;;  %s3109_s27 = scalar_lea.sflag [#allocation5], %s701_s0  ;;  %s3103_s21 = int_to_ptr.vmem [resolvable:$true] %s712_s21 }
  0xc2   : > { %p2712_p8 = pneg %p3105_p5 }
  0xc5   : > { %s3101_s20 = scalar_lea.hbm %s3686_s13, %s2148_s1  ;;  %s2715_s1 = scalar_lea.hbm %s3686_s13, 8192 }
  0xc6   : > { %s2710_s24 = scalar_lea.hbm %s3101_s20, 4096  ;;  %p2716_p11 = scmp.lt.u32.totalorder %s3101_s20, %s3686_s13 }
  0xc7   : > { %p2711_p6 = scmp.ne.s32.totalorder %s3101_s20, %s2710_s24  ;;  %p2717_p7 = scmp.lt.u32.totalorder %s2715_s1, %s2710_s24 }
  0xc8   : > { %p2719_p13 = scmp.lt.u32.totalorder %s2710_s24, %s3101_s20 }
  0xc9   : > { %p2713_p9 = pnand %p2712_p8, %p2711_p6  ;;  %p2718_p12 = por %p2717_p7, %p2716_p11 }
  0xcb   : > { %p2714_p10 = pneg %p2713_p9  ;;  %p2720_p0 = por %p2719_p13, %p2718_p12 }
  0xcd   : > { %p2721_p1 = pnand %p2720_p0, %p2714_p10 }
  0xcf   : > { %2724 = shalt.err (!%p2721_p1)
}
  0xd0   : > { %s2725_s0 = scalar_lea.vmem %s3103_s21, 4096  ;;  %s2811_s2 = smov [#allocation22]  }
  0xd1   : > { %p2726_p3 = scmp.ne.s32.totalorder %s3103_s21, %s2725_s0  ;;  %s2730_s3 = sshll.u32 %s2811_s2, 4  ;;  %s2731_s3 = int_to_ptr.vmem [resolvable:$false] %s2730_s3 }
  0xd2   : > { %s2732_s7 = scalar_lea.vmem %s2731_s3, 8192  ;;  %p2733_p9 = scmp.lt.s32.totalorder %s3103_s21, %s2731_s3 }
  0xd3   : > { %p2728_p4 = pnand %p2726_p3, %p2712_p8  ;;  %p2734_p11 = scmp.lt.s32.totalorder %s2732_s7, %s2725_s0 }
  0xd5   : > { %p2729_p6 = pneg %p2728_p4  ;;  %p2735_p7 = por %p2734_p11, %p2733_p9 }
  0xd7   : > { %p2736_p12 = pnand %p2735_p7, %p2729_p6 }
  0xd9   : > { %2739 = shalt.err (!%p2736_p12)
}
  0xda   : > { %s2812_s24 = smov 128   ;;  %s2813_s1 = smov 8  }
  0xdb   : > { %2420 = dma.hbm_to_vmem [thread:$0]  (!%p3105_p5), %s3101_s20, 4096, %s3103_s21, %s3109_s27, %s2812_s24, %s2812_s24, %s2813_s1  }
  0xdc   : > { %p3688_p8 = scmp.ne.s32.totalorder %s3669_s30, 0 }
  0xdd   : > { %p3689_p10 = scmp.eq.s32.totalorder (!%p3688_p8), %s2964_s4, 0 }
  0xde   : > { %744 = sbr.rel (%p3688_p8) target bundleno = 1845 (0x735), region = 104 }
  0xe5   : > { %2757 = dma.done.wait (%p3689_p10), [#allocation6], 32   ;;  %p3690_p13 = pmov %p3689_p10 }
  0xe6   : > { %p3691_p0 = pmov %p3689_p10 }
  0xe7   : > { %2759 = vsyncadd (%p3690_p13), [#allocation6], 4294967264 }
  0xe8   : > { %2761 = dma.done.wait (%p3691_p0), [#allocation8], 64   ;;  %p3692_p1 = pmov %p3691_p0 }
  0xe9   : > { %p3693_p3 = pmov %p3691_p0 }
  0xea   : > { %2763 = vsyncadd (%p3692_p1), [#allocation8], 4294967232 }
  0xeb   : > { %2765 = dma.done.wait (%p3693_p3), [#allocation11], 64   ;;  %p3694_p5 = pmov %p3691_p0 }
  0xec   : > { %p3695_p4 = pmov %p3691_p0 }
  0xed   : > { %2767 = vsyncadd (%p3694_p5), [#allocation11], 4294967232 }
  0xee   : > { %2769 = dma.done.wait (%p3695_p4), [#allocation14], 64   ;;  %p3696_p6 = pmov %p3691_p0 }
  0xef   : > { %p3697_p9 = pmov %p3691_p0 }
  0xf0   : > { %2771 = vsyncadd (%p3696_p6), [#allocation14], 4294967232 }
  0xf1   : > { %2773 = dma.done.wait (%p3697_p9), [#allocation17], 64   ;;  %p3698_p11 = pmov %p3691_p0 }
  0xf2   : > { %p3699_p7 = pmov %p3691_p0 }
  0xf3   : > { %2775 = vsyncadd (%p3698_p11), [#allocation17], 4294967232 }
  0xf4   : > { %2777 = dma.done.wait (%p3699_p7), [#allocation20], 64   ;;  %p3700_p12 = pmov %p3691_p0 }
  0xf5   : > { %s790_s30 = sand.u32 1, %s2790_s25  }
  0xf6   : > { %2779 = vsyncadd (%p3700_p12), [#allocation20], 4294967232  ;;  %s2132_s20 = sshll.u32 %s790_s30, 8  ;;  %s791_s21 = scalar_lea.sflag [#allocation5], %s790_s30 }
  0xf7   : > { %s3164_s28 = scalar_lea.vmem [#allocation22], %s2132_s20 }
  0xf8   : > { %2781 = dma.done.wait (%p3091_p2), %s791_s21, 4096  }
  0xf9   : > { %2783 = vsyncadd (%p3091_p2), %s791_s21, 4294963200 }
  0xfa   : > { %799 = sfence }
  0xfb   : > { %p871_p8 = scmp.lt.s32.totalorder %s2964_s4, 1  ;;  %vm894_vm0 = vcmask 156672   ;;  %v2814_v0 = vmov 0.0   ;;  %s3701_s0 = sld [smem:[#allocation34_spill]]  ;;  %vm900_vm1 = vcmask 140304   ;;  %vm947_vm2 = vcmask 123904  }
  0xfc   : > { %895 = vst.msk [vmem:[#allocation2] sm:$0x3] %vm894_vm0, %v2814_v0  ;;  %980 = vst [vmem:[#allocation3] sm:$0xf] %v2814_v0  ;;  %s2815_s3 = smov 2   ;;  %s3186_s7 = sshll.u32 %s2964_s4, 7 }
  0xfd   : > { %s3174_s27 = scalar_select %p871_p8, %s2964_s4, 1  ;;  %vm1192_vm3 = vcmask 107520   ;;  %vm1229_vm4 = vcmask 238720   ;;  %vm1267_vm5 = vcmask 369920   ;;  %vm1307_vm6 = vcmask 501120  }
  0xfe   : > { %s3189_s24 = sadd.s32 2, %s3186_s7  ;;  %s3192_s1 = sadd.s32 1, %s3186_s7  ;;  %vm1352_vm7 = vcmask 624128   ;;  %vm1397_vm8 = vcmask 755328   ;;  %vm1442_vm9 = vcmask 886528   ;;  %vm1491_vm10 = vcmask 1017728  }
  0xff   : > { %s3638_s9 = sshll.u32 %s3174_s27, 1  ;;  %s918_s30 = sld [smem:[#allocation4 + %s3189_s24]]  ;;  %vm1007_vm11 = vcmask 255104   ;;  %vm1027_vm12 = vcmask 386304   ;;  %vm1047_vm13 = vcmask 517504   ;;  %vm1076_vm14 = vcmask 640512  }
 0x100   : > { %s909_s20 = sld [smem:[#allocation4 + %s3192_s1]]  ;;  %s3197_s21 = sadd.s32 3, %s3186_s7  ;;  %vm1105_vm15 = vcmask 771712   ;;  %vm1135_vm0 = vcmask 902912  }
 0x101   : > { %s874_s2 = scalar_lea.vmem %s3701_s0, %s3638_s9  ;;  %s3200_s22 = sadd.s32 4, %s3186_s7 }
 0x102   : > { %v3182_v1 = vld [vmem:[%s874_s2] sm:$0x3]  ;;  %s927_s4 = sld [smem:[#allocation4 + %s3197_s21]]  ;;  %s3639_s0 = smov 126  }
 0x103   : > { %897 = vrot.lane.b32.xlu0 %v3182_v1, %s2815_s3  ;;  %s936_s5 = sld [smem:[#allocation4 + %s3200_s22]]  ;;  %s3643_s2 = smov 127  }
 0x104   : > { %s3641_s3 = smov 125   ;;  %s3702_s6 = sld [smem:[#allocation39_spill]] }
 0x105   : > { %v919_v3 = vstv %s918_s30  ;;  %s2819_s30 = smov 124   ;;  %s3221_s9 = sadd.s32 7, %s3186_s7 }
 0x106   : > { %v910_v4 = vstv %s909_s20  ;;  %s1198_s20 = sld [smem:[#allocation16 + %s3200_s22]]  ;;  %s1269_s13 = sadd.s32 9, %s3186_s7 }
 0x107   : > { %s1143_s12 = sld [smem:[#allocation13 + %s3221_s9]] }
 0x108   : > { %v928_v8 = vstv %s927_s4  ;;  %s3245_s26 = sld [smem:[#allocation16 + %s1269_s13]] }
 0x109   : > { %v937_v9 = vstv %s936_s5  ;;  %s904_s5 = sld [smem:[#allocation4 + %s3186_s7]] }
 0x10a   : > { %s877_s4 = scalar_lea.vmem %s3702_s6, %s3174_s27  ;;  %s971_s6 = sld [smem:[#allocation12 + %s3186_s7]] }
 0x10b   : > { %v2138_v12 = vld [vmem:[%s877_s4] ss:$0 sm:$0xff]  ;;  %s1243_s4 = sadd.s32 8, %s3186_s7  ;;  %s3255_s23 = sld [smem:[#allocation19 + %s1269_s13]] }
 0x10c   : > { %v967_v13 = vmul.f32 %v2138_v12, %v3182_v1  ;;  %s3234_s8 = sld [smem:[#allocation16 + %s1243_s4]]  ;;  %v1199_v37 = vstv %s1198_s20 }
 0x10d   : > { %s3247_s25 = sld [smem:[#allocation19 + %s1243_s4]]  ;;  %v1144_v46 = vstv %s1143_s12  ;;  %s3704_s12 = smov 126  }
 0x10e   : > { %v968_v14 = vsel %vm947_vm2, %v967_v13, 0.0  ;;  %v1271_v50 = vstv %s3245_s26  ;;  %s1082_s20 = sld [smem:[#allocation13 + %s3197_s21]] }
 0x10f   : > { %v905_v15 = vstv %s904_s5  ;;  %s1111_s5 = sadd.s32 5, %s3186_s7 }
 0x110   : > { %v972_v28 = vstv %s971_s6  ;;  %s3236_s10 = sld [smem:[#allocation16 + %s1111_s5]] }
 0x111   : > { %s3238_s11 = sld [smem:[#allocation13 + %s1111_s5]]  ;;  %v1404_v58 = vstv %s3255_s23  ;;  %s3705_s23 = sadd.s32 10, %s3186_s7 }
 0x112   : > { %s3257_s4 = sld [smem:[#allocation19 + %s1111_s5]]  ;;  %v1245_v47 = vstv %s3234_s8  ;;  %s1283_s8 = sadd.s32 11, %s3186_s7 }
 0x113   : > { %v1400_v51 = vstv %s3247_s25  ;;  %s1449_s25 = sadd.s32 13, %s3186_s7  ;;  %s1458_s5 = sadd.s32 14, %s3186_s7 }
 0x114   : > { %s1450_s26 = sld [smem:[#allocation19 + %s1449_s25]] }
 0x115   : > { %s1252_s25 = sld [smem:[#allocation18 + %s3189_s24]] }
 0x116   : > { %v1207_v48 = vstv %s3236_s10  ;;  %s1284_s10 = sld [smem:[#allocation16 + %s1283_s8]] }
 0x117   : > { %v1113_v45 = vstv %s3238_s11  ;;  %s1053_s11 = sld [smem:[#allocation13 + %s3192_s1]] }
 0x118   : > { %v1359_v59 = vstv %s3257_s4  ;;  %s3706_s4 = smov 125  }
 0x175   : > { %v898_v2 = vpop.permute.xlu0 %897 }
 0x176   : > { %901 = vst.msk [vmem:[#allocation2] sm:$0x3] %vm900_vm1, %v898_v2  ;;  %vm1166_vm1 = vcmask 1034112  }
 0x17d   : > { %v902_v5 = vld [vmem:[#allocation2] sm:$0x3] }
 0x17e   : > { %v920_v6 = vmul.f32 %v919_v3, %v902_v5  ;;  %v911_v7 = vmul.f32 %v910_v4, %v902_v5  ;;  %v929_v10 = vmul.f32 %v928_v8, %v902_v5  ;;  %v938_v11 = vmul.f32 %v937_v9, %v902_v5 }
 0x17f   : > { %v906_v16 = vmul.f32 %v905_v15, %v902_v5  ;;  %v1054_v8 = vstv %s1053_s11  ;;  %s1194_s11 = sld [smem:[#allocation16 + %s3197_s21]] }
 0x180   : > { %922 = vrot.lane.b32.xlu1 %v920_v6, %s3639_s0  ;;  %913 = vrot.lane.b32.xlu0 %v911_v7, %s3643_s2  ;;  %s944_s0 = sld [smem:[#allocation7 + %s3186_s7]]  ;;  %s3232_s2 = sadd.s32 6, %s3186_s7  ;;  %v1285_v7 = vstv %s1284_s10 }
 0x181   : > { %s3243_s29 = sld [smem:[#allocation16 + %s3232_s2]] }
 0x182   : > { %s1366_s13 = sld [smem:[#allocation19 + %s3232_s2]] }
 0x183   : > { %s1180_s10 = sld [smem:[#allocation16 + %s3189_s24]] }
 0x184   : > { %931 = vrot.lane.b32.xlu1 %v929_v10, %s3641_s3  ;;  %940 = vrot.lane.b32.xlu0 %v938_v11, %s2819_s30  ;;  %s1235_s30 = sld [smem:[#allocation16 + %s3221_s9]]  ;;  %v1451_v11 = vstv %s1450_s26 }
 0x185   : > { %s1313_s3 = sld [smem:[#allocation19 + %s3192_s1]] }
 0x186   : > { %v945_v24 = vstv %s944_s0  ;;  %s3647_s0 = sadd.s32 10, %s3186_s7  ;;  %s3364_s26 = sld [smem:[#allocation19 + %s3186_s7]] }
 0x187   : > { %s1275_s6 = sld [smem:[#allocation16 + %s3647_s0]]  ;;  %v1232_v49 = vstv %s3243_s29 }
 0x188   : > { %s3253_s0 = sld [smem:[#allocation13 + %s3232_s2]]  ;;  %v1367_v3 = vstv %s1366_s13  ;;  %s1467_s13 = sadd.s32 15, %s3186_s7 }
 0x189   : > { %s1411_s29 = sld [smem:[#allocation19 + %s3705_s23]] }
 0x18a   : > { %v1236_v36 = vstv %s1235_s30  ;;  %s3703_s30 = smov 127   ;;  %s1329_s2 = sld [smem:[#allocation19 + %s3197_s21]] }
 0x18b   : > { %v1314_v40 = vstv %s1313_s3  ;;  %s1321_s3 = sld [smem:[#allocation19 + %s3189_s24]] }
 0x18c   : > { %s3367_s23 = sld [smem:[#allocation19 + %s3200_s22]] }
 0x18d   : > { %v1276_v39 = vstv %s1275_s6  ;;  %s1419_s6 = sld [smem:[#allocation19 + %s1283_s8]] }
 0x18e   : > { %v1139_v57 = vstv %s3253_s0  ;;  %s1374_s0 = sld [smem:[#allocation19 + %s3221_s9]] }
 0x18f   : > { %v1412_v12 = vstv %s1411_s29  ;;  %s1459_s9 = sld [smem:[#allocation19 + %s1458_s5]] }
 0x190   : > { %v1330_v15 = vstv %s1329_s2  ;;  %s1172_s8 = sld [smem:[#allocation16 + %s3192_s1]] }
 0x191   : > { %v1322_v4 = vstv %s1321_s3  ;;  %s1468_s3 = sld [smem:[#allocation19 + %s1467_s13]] }
 0x192   : > { %s1292_s29 = sld [smem:[#allocation18 + %s3197_s21]] }
 0x193   : > { %s1061_s2 = sld [smem:[#allocation15 + %s3186_s7]] }
 0x194   : > { %s3384_s5 = sld [smem:[#allocation21 + %s3192_s1]] }
 0x1a3   : > { %969 = vadd.xlane.f32.xlu0 %v968_v14 }
 0x1f2   : > { %v923_v17 = vpop.permute.xlu1 %922  ;;  %v914_v18 = vpop.permute.xlu0 %913 }
 0x1f3   : > { %v916_v19 = vadd.f32 %v914_v18, %v906_v16  ;;  %v1375_v16 = vstv %s1374_s0  ;;  %s3376_s0 = sld [smem:[#allocation13 + %s3189_s24]] }
 0x1f5   : > { %v925_v20 = vadd.f32 %v923_v17, %v916_v19  ;;  %v1083_v19 = vstv %s1082_s20  ;;  %s3381_s20 = sld [smem:[#allocation21 + %s3186_s7]] }
 0x1f6   : > { %v932_v21 = vpop.permute.xlu1 %931  ;;  %v941_v23 = vpop.permute.xlu0 %940 }
 0x1f7   : > { %v934_v22 = vadd.f32 %v932_v21, %v925_v20  ;;  %v1460_v21 = vstv %s1459_s9  ;;  %s3391_s9 = sld [smem:[#allocation15 + %s3192_s1]] }
 0x1f9   : > { %v943_v25 = vadd.f32 %v941_v23, %v934_v22  ;;  %v1420_v23 = vstv %s1419_s6  ;;  %s1444_s6 = sadd.s32 12, %s3186_s7 }
 0x1fa   : > { %s3396_s13 = sld [smem:[#allocation19 + %s1444_s6]] }
 0x1fb   : > { %v3215_v26 = vadd.f32 %v945_v24, %v943_v25  ;;  %v1469_v25 = vstv %s1468_s3  ;;  %s2822_s3 = smov 32   ;;  %s3443_s6 = sld [smem:[#allocation10 + %s3192_s1]] }
 0x1fd   : > { %v948_v27 = vsel %vm947_vm2, %v3215_v26, -inf }
 0x1fe   : > { %949 = vmax.xlane.f32.xlu1 %v948_v27 }
 0x230   : > { %v970_v29 = vpop.xlane.xlu0 %969 }
 0x231   : > { %v973_v30 = vadd.f32 %v972_v28, %v970_v29  ;;  %v1181_v28 = vstv %s1180_s10  ;;  %s1427_s10 = sld [smem:[#allocation21 + %s3189_s24]] }
 0x233   : > { %v974_v31 = vsub.f32 0.0, %v973_v30 }
 0x235   : > { %v975_v32 = vmul.f32 1.442695, %v974_v31 }
 0x237   : > { %2505 = vpow2.f32 %v975_v32 }
 0x241   : > { %v2506_v33 = vpop.eup %2505 }
 0x242   : > { %v977_v34 = vadd.f32 1.0, %v2506_v33 }
 0x244   : > { %2507 = vrcp.f32 %v977_v34 }
 0x24e   : > { %v2508_v35 = vpop.eup %2507 }
 0x24f   : > { %v3250_v38 = vmul.f32 %v2508_v35, %v3182_v1  ;;  %v1173_v35 = vstv %s1172_s8  ;;  %s1476_s8 = sld [smem:[#allocation21 + %s3197_s21]] }
 0x251   : > { %v1237_v41 = vmul.f32 %v1236_v36, %v3250_v38  ;;  %v1200_v42 = vmul.f32 %v1199_v37, %v3250_v38  ;;  %v1277_v43 = vmul.f32 %v1276_v39, %v3250_v38  ;;  %v1315_v44 = vmul.f32 %v1314_v40, %v3250_v38 }
 0x252   : > { %v3274_v52 = vmul.f32 %v1113_v45, %v3250_v38  ;;  %v3277_v53 = vmul.f32 %v1144_v46, %v3250_v38  ;;  %v1246_v54 = vmul.f32 %v1245_v47, %v3250_v38  ;;  %v1208_v55 = vmul.f32 %v1207_v48, %v3250_v38 }
 0x253   : > { %1239 = vrot.lane.b32.xlu0 %v1237_v41, %s3703_s30  ;;  %1202 = vrot.lane.b32.xlu1 %v1200_v42, %s3703_s30  ;;  %v3285_v56 = vmul.f32 %v1232_v49, %v3250_v38  ;;  %v3291_v60 = vmul.f32 %v1271_v50, %v3250_v38  ;;  %v3294_v61 = vmul.f32 %v1400_v51, %v3250_v38  ;;  %v1195_v39 = vstv %s1194_s11  ;;  %s2823_s11 = smov 48  }
 0x254   : > { %v3300_v62 = vmul.f32 %v1139_v57, %v3250_v38  ;;  %v1405_v63 = vmul.f32 %v1404_v58, %v3250_v38  ;;  %v1360_v2 = vmul.f32 %v1359_v59, %v3250_v38  ;;  %v1368_v5 = vmul.f32 %v1367_v3, %v3250_v38 }
 0x255   : > { %v1323_v6 = vmul.f32 %v1322_v4, %v3250_v38  ;;  %v1286_v9 = vmul.f32 %v1285_v7, %v3250_v38  ;;  %v1055_v10 = vmul.f32 %v1054_v8, %v3250_v38  ;;  %v1452_v13 = vmul.f32 %v1451_v11, %v3250_v38 }
 0x256   : > { %v1413_v14 = vmul.f32 %v1412_v12, %v3250_v38  ;;  %v1331_v17 = vmul.f32 %v1330_v15, %v3250_v38  ;;  %v1376_v18 = vmul.f32 %v1375_v16, %v3250_v38  ;;  %v1084_v20 = vmul.f32 %v1083_v19, %v3250_v38 }
 0x257   : > { %1279 = vrot.lane.b32.xlu0 %v1277_v43, %s3703_s30  ;;  %1317 = vrot.lane.b32.xlu1 %v1315_v44, %s3703_s30  ;;  %v1461_v22 = vmul.f32 %v1460_v21, %v3250_v38  ;;  %v1421_v24 = vmul.f32 %v1420_v23, %v3250_v38  ;;  %v1470_v27 = vmul.f32 %v1469_v25, %v3250_v38  ;;  %v1253_v48 = vstv %s1252_s25  ;;  %s2825_s25 = smov 80  }
 0x258   : > { %v1182_v29 = vmul.f32 %v1181_v28, %v3250_v38  ;;  %v1174_v36 = vmul.f32 %v1173_v35, %v3250_v38  ;;  %v1196_v42 = vmul.f32 %v1195_v39, %v3250_v38  ;;  %v1000_v57 = vlaneseq }
 0x259   : > { %v1355_v7 = vstv %s3367_s23  ;;  %v1293_v8 = vstv %s1292_s29  ;;  %v1338_v28 = vstv %s3381_s20  ;;  %s1107_s23 = sld [smem:[#allocation13 + %s3200_s22]] }
 0x25a   : > { %v1001_v3 = vshrl.u32 %v1000_v57, 7  ;;  %v1356_v15 = vmul.f32 %v1355_v7, %v3250_v38  ;;  %s1120_s29 = sld [smem:[#allocation15 + %s3189_s24]] }
 0x25b   : > { %1248 = vrot.lane.b32.xlu0 %v1246_v54, %s3704_s12  ;;  %1210 = vrot.lane.b32.xlu1 %v1208_v55, %s3704_s12  ;;  %v2820_v55 = vmov 1983009808   ;;  %s3431_s22 = sld [smem:[#allocation9 + %s3192_s1]] }
 0x25c   : > { %s3434_s20 = sld [smem:[#allocation9 + %s3189_s24]] }
 0x25f   : > { %1407 = vrot.lane.b32.xlu0 %v1405_v63, %s3703_s30  ;;  %1362 = vrot.lane.b32.xlu1 %v1360_v2, %s3703_s30 }
 0x263   : > { %1370 = vrot.lane.b32.xlu0 %v1368_v5, %s3704_s12  ;;  %1325 = vrot.lane.b32.xlu1 %v1323_v6, %s3704_s12  ;;  %v1310_v6 = vstv %s3364_s26  ;;  %s2827_s26 = smov 112  }
 0x267   : > { %1288 = vrot.lane.b32.xlu1 %v1286_v9, %s3704_s12  ;;  %1057 = vrot.lane.b32.xlu0 %v1055_v10, %s3703_s30  ;;  %v1062_v10 = vstv %s1061_s2  ;;  %s3424_s2 = sld [smem:[#allocation16 + %s3186_s7]] }
 0x26b   : > { %1454 = vrot.lane.b32.xlu1 %v1452_v13, %s3703_s30  ;;  %1415 = vrot.lane.b32.xlu0 %v1413_v14, %s3704_s12 }
 0x26f   : > { %1333 = vrot.lane.b32.xlu1 %v1331_v17, %s3706_s4  ;;  %1378 = vrot.lane.b32.xlu0 %v1376_v18, %s3706_s4 }
 0x273   : > { %1086 = vrot.lane.b32.xlu1 %v1084_v20, %s3703_s30 }
 0x277   : > { %1463 = vrot.lane.b32.xlu1 %v1461_v22, %s3704_s12 }
 0x27b   : > { %1423 = vrot.lane.b32.xlu1 %v1421_v24, %s3706_s4 }
 0x27f   : > { %1472 = vrot.lane.b32.xlu1 %v1470_v27, %s3706_s4  ;;  %s2821_s4 = smov 16  }
 0x283   : > { %1184 = vrot.lane.b32.xlu1 %v1182_v29, %s3704_s12  ;;  %s1214_s12 = sld [smem:[#allocation18 + %s3192_s1]]  ;;  %s2149_s1 = sshll.u32 %s3174_s27, 7 }
 0x289   : > { %v1215_v46 = vstv %s1214_s12  ;;  %s2824_s12 = smov 64  }
 0x28b   : > { %v950_v30 = vpop.xlane.xlu1 %949 }
 0x28c   : > { %v951_v31 = vsub.f32 %v3215_v26, %v950_v30  ;;  %v1383_v30 = vstv %s3384_s5  ;;  %s3437_s5 = sld [smem:[#allocation10 + %s3186_s7]] }
 0x28e   : > { %v952_v32 = vmul.f32 1.442695, %v951_v31 }
 0x290   : > { %2509 = vpow2.f32 %v952_v32  ;;  %v1079_v32 = vstv %s3376_s0  ;;  %s3428_s0 = sld [smem:[#allocation9 + %s3186_s7]] }
 0x291   : > { %v1080_v39 = vmul.f32 %v1079_v32, %v3250_v38  ;;  %v1496_v32 = vld [vmem:[%s3164_s28 + $0x10] sm:$0xff] }
 0x29a   : > { %v3346_v33 = vpop.eup %2509 }
 0x29b   : > { %v954_v34 = vsel %vm947_vm2, %v3346_v33, 0.0 }
 0x29c   : > { %955 = vadd.xlane.f32.xlu0 %v954_v34 }
 0x2b2   : > { %1116 = vrot.lane.b32.xlu0 %v3274_v52, %s3703_s30 }
 0x2b6   : > { %1147 = vrot.lane.b32.xlu0 %v3277_v53, %s3703_s30 }
 0x2ba   : > { %1176 = vrot.lane.b32.xlu0 %v1174_v36, %s3703_s30  ;;  %s1049_s30 = sld [smem:[#allocation13 + %s3186_s7]] }
 0x2c0   : > { %v1050_v63 = vstv %s1049_s30  ;;  %s2826_s30 = smov 96  }
 0x2c1   : > { %v1051_v5 = vmul.f32 %v1050_v63, %v3250_v38 }
 0x2c5   : > { %v1240_v26 = vpop.permute.xlu0 %1239  ;;  %v1203_v37 = vpop.permute.xlu1 %1202 }
 0x2c6   : > { %v1242_v43 = vadd.f32 %v1240_v26, %v3285_v56  ;;  %v1205_v44 = vadd.f32 %v1203_v37, %v1196_v42  ;;  %v998_v56 = vunpack.c.l.s4 %v2820_v55 }
 0x2c8   : > { %v999_v2 = vunpack.c.0.s8 %v998_v56 }
 0x2c9   : > { %v1280_v40 = vpop.permute.xlu0 %1279  ;;  %v1318_v41 = vpop.permute.xlu1 %1317 }
 0x2ca   : > { %v1282_v4 = vadd.f32 %v1280_v40, %v3291_v60  ;;  %v3386_v14 = vsub.s32 %v999_v2, %v1001_v3  ;;  %v1311_v60 = vmul.f32 %v1310_v6, %v3250_v38  ;;  %v1091_v40 = vstv %s3391_s9  ;;  %s3440_s9 = sld [smem:[#allocation18 + %s3186_s7]] }
 0x2cb   : > { %v1477_v2 = vstv %s1476_s8  ;;  %s3468_s7 = sld [smem:[#allocation10 + %s3197_s21]]  ;;  %s3519_s8 = scalar_lea.vmem %s3629_s15, %s2149_s1 }
 0x2cc   : > { %v1320_v21 = vadd.f32 %v1318_v41, %v1311_v60  ;;  %v1108_v60 = vstv %s1107_s23 }
 0x2cd   : > { %v1249_v45 = vpop.permute.xlu0 %1248  ;;  %v1211_v47 = vpop.permute.xlu1 %1210 }
 0x2ce   : > { %v1251_v49 = vadd.f32 %v1249_v45, %v1242_v43  ;;  %v1213_v50 = vadd.f32 %v1211_v47, %v1205_v44 }
 0x2d0   : > { %v1216_v51 = vadd.f32 %v1215_v46, %v1213_v50  ;;  %v1254_v52 = vadd.f32 %v1253_v48, %v1251_v49  ;;  %v1446_v46 = vstv %s3396_s13  ;;  %s3446_s13 = sld [smem:[#allocation9 + %s3197_s21]] }
 0x2d1   : > { %v3369_v53 = vpop.permute.xlu0 %1407  ;;  %v1363_v54 = vpop.permute.xlu1 %1362 }
 0x2d2   : > { %2511 = vtanh.f32 %v1216_v51  ;;  %v1365_v22 = vadd.f32 %v1363_v54, %v1356_v15  ;;  %v1410_v49 = vadd.f32 %v3369_v53, %v3294_v61  ;;  %v1447_v51 = vmul.f32 %v1446_v46, %v3250_v38 }
 0x2d3   : > { %2513 = vtanh.f32 %v1254_v52  ;;  %v1428_v54 = vstv %s1427_s10  ;;  %v1109_v15 = vmul.f32 %v1108_v60, %v3250_v38  ;;  %s3452_s10 = sld [smem:[#allocation10 + %s3189_s24]] }
 0x2d4   : > { %s3478_s24 = sld [smem:[#allocation15 + %s3197_s21]] }
 0x2d5   : > { %v1371_v58 = vpop.permute.xlu0 %1370  ;;  %v1326_v59 = vpop.permute.xlu1 %1325 }
 0x2d6   : > { %v1373_v25 = vadd.f32 %v1371_v58, %v1365_v22  ;;  %v1328_v27 = vadd.f32 %v1326_v59, %v1320_v21  ;;  %v1169_v21 = vstv %s3424_s2  ;;  %v1510_v22 = vld [vmem:[%s3164_s28 + $0x80] sm:$0xff] }
 0x2d9   : > { %v1289_v9 = vpop.permute.xlu1 %1288  ;;  %v1058_v11 = vpop.permute.xlu0 %1057 }
 0x2da   : > { %v1291_v12 = vadd.f32 %v1289_v9, %v1282_v4  ;;  %v1060_v13 = vadd.f32 %v1058_v11, %v1051_v5 }
 0x2dc   : > { %v1294_v16 = vadd.f32 %v1293_v8, %v1291_v12  ;;  %v1063_v17 = vadd.f32 %v1062_v10, %v1060_v13  ;;  %v2512_v18 = vpop.eup %2511 }
 0x2dd   : > { %v1455_v19 = vpop.permute.xlu1 %1454  ;;  %v1416_v20 = vpop.permute.xlu0 %1415  ;;  %v1225_v23 = vrot.slane %v2512_v18, %v3386_v14 }
 0x2de   : > { %2515 = vtanh.f32 %v1294_v16  ;;  %v2514_v24 = vpop.eup %2513  ;;  %v1418_v52 = vadd.f32 %v1416_v20, %v1410_v49  ;;  %v1457_v56 = vadd.f32 %v1455_v19, %v1447_v51  ;;  %v1121_v16 = vstv %s1120_s29 }
 0x2df   : > { %2517 = vtanh.f32 %v1063_v17  ;;  %1226 = vrot.lane.b32.xlu1 %v1225_v23, %s2821_s4  ;;  %v1263_v36 = vrot.slane %v2514_v24, %v3386_v14  ;;  %v1511_v23 = vld [vmem:[%s3164_s28 + $0x88] sm:$0xff]  ;;  %v1494_v24 = vld [vmem:[%s3164_s28] sm:$0xff]  ;;  %v985_v49 = vstv %s3437_s5 }
 0x2e0   : > { %v1030_v51 = vstv %s3446_s13 }
 0x2e1   : > { %v1334_v29 = vpop.permute.xlu1 %1333  ;;  %v1379_v31 = vpop.permute.xlu0 %1378 }
 0x2e2   : > { %v1336_v34 = vadd.f32 %v1334_v29, %v1328_v27  ;;  %v1381_v35 = vadd.f32 %v1379_v31, %v1373_v25  ;;  %v2269_v25 = vpack.c.bf16 %v1511_v23, %v1510_v22  ;;  %v1495_v27 = vld [vmem:[%s3164_s28 + $0x8] sm:$0xff]  ;;  %v1513_v29 = vld [vmem:[%s3164_s28 + $0x98] sm:$0xff]  ;;  %v1520_v23 = vld [vmem:[%s3164_s28 + $0xd0] sm:$0xff] }
 0x2e3   : > { %1264 = vrot.lane.b32.xlu1 %v1263_v36, %s2822_s3 }
 0x2e4   : > { %v1339_v26 = vadd.f32 %v1338_v28, %v1336_v34  ;;  %v1384_v37 = vadd.f32 %v1383_v30, %v1381_v35  ;;  %v1512_v28 = vld [vmem:[%s3164_s28 + $0x90] sm:$0xff]  ;;  %v2271_v30 = vpack.c.bf16 %v1495_v27, %v1494_v24  ;;  %v1497_v34 = vld [vmem:[%s3164_s28 + $0x18] sm:$0xff]  ;;  %v1514_v35 = vld [vmem:[%s3164_s28 + $0xa0] sm:$0xff]  ;;  %2270 = vmatprep.subr.bf16.mxu0 %v2269_v25 }
 0x2e5   : > { %v1087_v41 = vpop.permute.xlu1 %1086  ;;  %v2273_v31 = vpack.c.bf16 %v1513_v29, %v1512_v28  ;;  %v1521_v24 = vld [vmem:[%s3164_s28 + $0xd8] sm:$0xff]  ;;  %v1504_v29 = vld [vmem:[%s3164_s28 + $0x50] sm:$0xff] }
 0x2e6   : > { %2519 = vtanh.f32 %v1339_v26  ;;  %v1089_v42 = vadd.f32 %v1087_v41, %v1080_v39  ;;  %v1170_v26 = vmul.f32 %v1169_v21, %v3250_v38  ;;  %v982_v39 = vstv %s3428_s0  ;;  %2272 = vmatpush3.bf16.msra.mxu0 %v2271_v30  ;;  %v1505_v30 = vld [vmem:[%s3164_s28 + $0x58] sm:$0xff] }
 0x2e7   : > { %2521 = vtanh.f32 %v1384_v37  ;;  %v1515_v37 = vld [vmem:[%s3164_s28 + $0xa8] sm:$0xff]  ;;  %2274 = vmatprep.subr.bf16.mxu0 %v2273_v31  ;;  %v2289_v27 = vpack.c.bf16 %v1521_v24, %v1520_v23 }
 0x2e8   : > { %v2516_v43 = vpop.eup %2515  ;;  %v1092_v44 = vadd.f32 %v1091_v40, %v1089_v42  ;;  %v2275_v42 = vpack.c.bf16 %v1497_v34, %v1496_v32  ;;  %v2277_v38 = vpack.c.bf16 %v1515_v37, %v1514_v35  ;;  %v2291_v32 = vpack.c.bf16 %v1505_v30, %v1504_v29  ;;  %v1522_v34 = vld [vmem:[%s3164_s28 + $0xe0] sm:$0xff]  ;;  %v1523_v35 = vld [vmem:[%s3164_s28 + $0xe8] sm:$0xff] }
 0x2e9   : > { %v2518_v45 = vpop.eup %2517  ;;  %v1464_v47 = vpop.permute.xlu1 %1463  ;;  %v1303_v48 = vrot.slane %v2516_v43, %v3386_v14  ;;  %v1507_v37 = vld [vmem:[%s3164_s28 + $0x68] sm:$0xff] }
 0x2ea   : > { %2523 = vtanh.f32 %v1092_v44  ;;  %v1072_v50 = vrot.slane %v2518_v45, %v3386_v14  ;;  %v1466_v59 = vadd.f32 %v1464_v47, %v1457_v56  ;;  %v990_v44 = vstv %s3431_s22  ;;  %2276 = vmatpush3.bf16.msra.mxu0 %v2275_v42  ;;  %v1629_v24 = vld [vmem:[%s3519_s8 + $0x70] sm:$0xff]  ;;  %v1709_v29 = vld [vmem:[%s3631_s17 + $0x8] sm:$0xff] }
 0x2eb   : > { %1304 = vrot.lane.b32.xlu1 %v1303_v48, %s2823_s11  ;;  %v1010_v45 = vstv %s3434_s20  ;;  %v1189_v48 = vstv %s3440_s9  ;;  %v1013_v56 = vstv %s3452_s10  ;;  %2278 = vmatprep.subr.bf16.mxu0 %v2277_v38  ;;  %s888_s10 = scalar_lea.vmem %s3630_s16, %s3174_s27 }
 0x2ec   : > { %1073 = vrot.lane.b32.xlu0 %v1072_v50, %s2824_s12 }
 0x2ed   : > { %v1424_v55 = vpop.permute.xlu1 %1423 }
 0x2ee   : > { %v1426_v57 = vadd.f32 %v1424_v55, %v1418_v52 }
 0x2f0   : > { %v2520_v58 = vpop.eup %2519  ;;  %v1429_v63 = vadd.f32 %v1428_v54, %v1426_v57 }
 0x2f1   : > { %v1473_v61 = vpop.permute.xlu1 %1472  ;;  %v1348_v53 = vrot.slane %v2520_v58, %v3386_v14  ;;  %v2522_v3 = vpop.eup %2521 }
 0x2f2   : > { %2525 = vtanh.f32 %v1429_v63  ;;  %v1475_v4 = vadd.f32 %v1473_v61, %v1466_v59  ;;  %v1393_v7 = vrot.slane %v2522_v3, %v3386_v14  ;;  %v1498_v3 = vld [vmem:[%s3164_s28 + $0x20] sm:$0xff] }
 0x2f3   : > { %1349 = vrot.lane.b32.xlu1 %v1348_v53, %s2824_s12  ;;  %v1033_v53 = vstv %s3468_s7  ;;  %s3708_s12 = sshll.u32 %s3174_s27, 1 }
 0x2f4   : > { %v2524_v5 = vpop.eup %2523  ;;  %v1478_v6 = vadd.f32 %v1477_v2, %v1475_v4  ;;  %v1499_v4 = vld [vmem:[%s3164_s28 + $0x28] sm:$0xff] }
 0x2f5   : > { %v1101_v8 = vrot.slane %v2524_v5, %v3386_v14  ;;  %v1185_v46 = vpop.permute.xlu1 %1184  ;;  %v2279_v5 = vpack.c.bf16 %v1499_v4, %v1498_v3  ;;  %v1623_v3 = vld [vmem:[%s3519_s8 + $0x40] sm:$0xff]  ;;  %v1624_v4 = vld [vmem:[%s3519_s8 + $0x48] sm:$0xff] }
 0x2f6   : > { %2527 = vtanh.f32 %v1478_v6  ;;  %v1516_v6 = vld [vmem:[%s3164_s28 + $0xb0] sm:$0xff] }
 0x2f7   : > { %1394 = vrot.lane.b32.xlu1 %v1393_v7, %s2825_s25  ;;  %1102 = vrot.lane.b32.xlu0 %v1101_v8, %s2825_s25  ;;  %v1517_v7 = vld [vmem:[%s3164_s28 + $0xb8] sm:$0xff] }
 0x2f8   : > { %v2281_v8 = vpack.c.bf16 %v1517_v7, %v1516_v6  ;;  %2280 = vmatpush3.bf16.msra.mxu0 %v2279_v5  ;;  %v2314_v5 = vpack.c.bf16 %v1624_v4, %v1623_v3  ;;  %v1625_v7 = vld [vmem:[%s3519_s8 + $0x50] sm:$0xff] }
 0x2fa   : > { %2282 = vmatprep.subr.bf16.mxu0 %v2281_v8  ;;  %v1626_v8 = vld [vmem:[%s3519_s8 + $0x58] sm:$0xff] }
 0x2fc   : > { %v2526_v9 = vpop.eup %2525 }
 0x2fd   : > { %v1438_v10 = vrot.slane %v2526_v9, %v3386_v14 }
 0x2ff   : > { %1439 = vrot.lane.b32.xlu1 %v1438_v10, %s2826_s30 }
 0x300   : > { %v2528_v11 = vpop.eup %2527 }
 0x301   : > { %v1487_v12 = vrot.slane %v2528_v11, %v3386_v14  ;;  %v1152_v11 = vstv %s3478_s24 }
 0x303   : > { %1488 = vrot.lane.b32.xlu1 %v1487_v12, %s2827_s26  ;;  %v1500_v12 = vld [vmem:[%s3164_s28 + $0x30] sm:$0xff] }
 0x329   : > { %v956_v13 = vpop.xlane.xlu0 %955 }
 0x32a   : > { %2529 = vrcp.f32 %v956_v13  ;;  %v1501_v13 = vld [vmem:[%s3164_s28 + $0x38] sm:$0xff] }
 0x32b   : > { %v2283_v60 = vpack.c.bf16 %v1501_v13, %v1500_v12 }
 0x32d   : > { %v1117_v17 = vpop.permute.xlu0 %1116  ;;  %2284 = vmatpush3.bf16.msra.mxu0 %v2283_v60 }
 0x32e   : > { %v1119_v18 = vadd.f32 %v1117_v17, %v1109_v15  ;;  %v1518_v15 = vld [vmem:[%s3164_s28 + $0xc0] sm:$0xff] }
 0x330   : > { %v1122_v19 = vadd.f32 %v1121_v16, %v1119_v18  ;;  %v1519_v16 = vld [vmem:[%s3164_s28 + $0xc8] sm:$0xff] }
 0x331   : > { %v3448_v20 = vpop.permute.xlu0 %1147  ;;  %v2285_v17 = vpack.c.bf16 %v1519_v16, %v1518_v15 }
 0x332   : > { %2531 = vtanh.f32 %v1122_v19  ;;  %v1150_v9 = vadd.f32 %v3448_v20, %v3300_v62  ;;  %v1502_v62 = vld [vmem:[%s3164_s28 + $0x40] sm:$0xff]  ;;  %v1503_v19 = vld [vmem:[%s3164_s28 + $0x48] sm:$0xff] }
 0x333   : > { %2286 = vmatprep.subr.bf16.mxu0 %v2285_v17  ;;  %v2287_v21 = vpack.c.bf16 %v1503_v19, %v1502_v62 }
 0x334   : > { %v2530_v36 = vpop.eup %2529  ;;  %v1153_v18 = vadd.f32 %v1152_v11, %v1150_v9  ;;  %v2317_v9 = vpack.c.bf16 %v1626_v8, %v1625_v7 }
 0x335   : > { %v958_v40 = vmul.f32 %v2530_v36, %v3346_v33  ;;  %v1177_v41 = vpop.permute.xlu0 %1176  ;;  %v993_v33 = vstv %s3443_s6  ;;  %2288 = vmatpush3.bf16.msra.mxu0 %v2287_v21  ;;  %v1506_v36 = vld [vmem:[%s3164_s28 + $0x60] sm:$0xff] }
 0x336   : > { %v1179_v43 = vadd.f32 %v1177_v41, %v1170_v26  ;;  %2290 = vmatprep.subr.bf16.mxu0 %v2289_v27  ;;  %v2293_v26 = vpack.c.bf16 %v1523_v35, %v1522_v34  ;;  %v2295_v41 = vpack.c.bf16 %v1507_v37, %v1506_v36  ;;  %v1627_v21 = vld [vmem:[%s3519_s8 + $0x60] sm:$0xff]  ;;  %v1710_v37 = vld [vmem:[%s3631_s17 + $0x10] sm:$0xff] }
 0x337   : > { %v959_v47 = vmul.f32 %v958_v40, %v3182_v1  ;;  %v1525_v40 = vld [vmem:[%s3164_s28 + $0xf8] sm:$0xff] }
 0x338   : > { %v1187_v50 = vadd.f32 %v1185_v46, %v1179_v43 }
 0x339   : > { %v983_v52 = vmul.f32 %v982_v39, %v959_v47  ;;  %v991_v54 = vmul.f32 %v990_v44, %v959_v47  ;;  %v1011_v55 = vmul.f32 %v1010_v45, %v959_v47  ;;  %v1031_v2 = vmul.f32 %v1030_v51, %v959_v47  ;;  %v1524_v39 = vld [vmem:[%s3164_s28 + $0xf0] sm:$0xff]  ;;  %2292 = vmatpush3.bf16.msra.mxu0 %v2291_v32  ;;  %v1509_v45 = vld [vmem:[%s3164_s28 + $0x78] sm:$0xff]  ;;  %v1616_v51 = vld [vmem:[%s3519_s8 + $0x8] sm:$0xff] }
 0x33a   : > { %v1190_v57 = vadd.f32 %v1189_v48, %v1187_v50  ;;  %2294 = vmatprep.subr.bf16.mxu0 %v2293_v26  ;;  %v2297_v43 = vpack.c.bf16 %v1525_v40, %v1524_v39  ;;  %v1508_v44 = vld [vmem:[%s3164_s28 + $0x70] sm:$0xff] }
 0x33b   : > { %v986_v1 = vadd.f32 %v985_v49, %v983_v52  ;;  %v994_v58 = vadd.f32 %v993_v33, %v991_v54  ;;  %v1014_v63 = vadd.f32 %v1013_v56, %v1011_v55  ;;  %v1034_v10 = vadd.f32 %v1033_v53, %v1031_v2  ;;  %v1615_v33 = vld [vmem:[%s3519_s8] sm:$0xff]  ;;  %v1617_v52 = vld [vmem:[%s3519_s8 + $0x10] sm:$0xff]  ;;  %v1711_v39 = vld [vmem:[%s3631_s17 + $0x18] sm:$0xff] }
 0x33c   : > { %v2532_v59 = vpop.eup %2531  ;;  %2533 = vtanh.f32 %v1190_v57  ;;  %v2299_v46 = vpack.c.bf16 %v1509_v45, %v1508_v44  ;;  %v2828_v55 = vmov 0.0|0.0   ;;  %v2302_v56 = vpack.c.bf16 %v1616_v51, %v1615_v33  ;;  %v1618_v57 = vld [vmem:[%s3519_s8 + $0x18] sm:$0xff]  ;;  %v1621_v2 = vld [vmem:[%s3519_s8 + $0x30] sm:$0xff] }
 0x33d   : > { %2535 = vtanh.f32 %v986_v1  ;;  %v1131_v61 = vrot.slane %v2532_v59, %v3386_v14  ;;  %2296 = vmatpush3.bf16.msra.mxu0 %v2295_v41  ;;  %2301 = vmatprep.subr.bf16.mxu1 %v2828_v55  ;;  %v1619_v1 = vld [vmem:[%s3519_s8 + $0x20] sm:$0xff]  ;;  %v2329_v40 = vpack.c.bf16 %v1711_v39, %v1710_v37 }
 0x33e   : > { %2537 = vtanh.f32 %v994_v58  ;;  %2298 = vmatprep.subr.bf16.mxu0 %v2297_v43  ;;  %2303 = vmatpush3.bf16.msra.mxu1 %v2302_v56  ;;  %v1620_v58 = vld [vmem:[%s3519_s8 + $0x28] sm:$0xff]  ;;  %v1794_v41 = vld [vmem:[%s3633_s19] sm:$0xff] }
 0x33f   : > { %1132 = vrot.lane.b32.xlu0 %v1131_v61, %s2826_s30  ;;  %2539 = vtanh.f32 %v1014_v63  ;;  %2304 = vmatprep.subr.bf16.mxu1 %v2828_v55  ;;  %v2308_v59 = vpack.c.bf16 %v1620_v58, %v1619_v1  ;;  %v1622_v61 = vld [vmem:[%s3519_s8 + $0x38] sm:$0xff] }
 0x340   : > { %2541 = vtanh.f32 %v1034_v10  ;;  %v2311_v53 = vpack.c.bf16 %v1622_v61, %v1621_v2 }
 0x341   : > { %2543 = vtanh.f32 %v1153_v18  ;;  %2300 = vmatpush3.bf16.msra.mxu0 %v2299_v46  ;;  %v1796_v46 = vld [vmem:[%s3633_s19 + $0x10] sm:$0xff] }
 0x342   : > { %2325 = vmatprep.subr.bf16.mxu0 %v2828_v55 }
 0x346   : > { %v2534_v20 = vpop.eup %2533 }
 0x347   : > { %v2536_v22 = vpop.eup %2535  ;;  %1193 = vst.msk [vmem:[#allocation3 + $0x2] sm:$0x3] %vm1192_vm3, %v2534_v20  ;;  %vm1719_vm3 = vcmask 261120  }
 0x348   : > { %v2538_v25 = vpop.eup %2537  ;;  %988 = vst.msk [vmem:[#allocation3] sm:$0x3] %vm947_vm2, %v2536_v22  ;;  %v1628_v22 = vld [vmem:[%s3519_s8 + $0x68] sm:$0xff]  ;;  %vm2829_vm2 = vmmov 0  }
 0x349   : > { %v1003_v28 = vrot.slane %v2538_v25, %v3386_v14  ;;  %v2540_v31 = vpop.eup %2539  ;;  %v2320_v23 = vpack.c.bf16 %v1628_v22, %v1627_v21  ;;  %v1630_v25 = vld [vmem:[%s3519_s8 + $0x78] sm:$0xff]  ;;  %2244 = vmatprep.mubr.msk.f32.mxu1 %vm2829_vm2, %v2814_v0 }
 0x34a   : > { %v1023_v42 = vrot.slane %v2540_v31, %v3386_v14  ;;  %v2542_v38 = vpop.eup %2541  ;;  %v2323_v27 = vpack.c.bf16 %v1630_v25, %v1629_v24 }
 0x34b   : > { %1004 = vrot.lane.b32.xlu0 %v1003_v28, %s2821_s4  ;;  %v1043_v47 = vrot.slane %v2542_v38, %v3386_v14  ;;  %v2544_v48 = vpop.eup %2543  ;;  %v1708_v28 = vld [vmem:[%s3631_s17] sm:$0xff] }
 0x34c   : > { %v1162_v50 = vrot.slane %v2544_v48, %v3386_v14  ;;  %v2305_v14 = vpack.c.bf16 %v1618_v57, %v1617_v52  ;;  %v2326_v30 = vpack.c.bf16 %v1709_v29, %v1708_v28 }
 0x34e   : > { %2306 = vmatpush3.bf16.msra.mxu1 %v2305_v14 }
 0x34f   : > { %1024 = vrot.lane.b32.xlu0 %v1023_v42, %s2822_s3  ;;  %2307 = vmatprep.subr.bf16.mxu1 %v2828_v55  ;;  %v1795_v42 = vld [vmem:[%s3633_s19 + $0x8] sm:$0xff] }
 0x350   : > { %v2332_v43 = vpack.c.bf16 %v1795_v42, %v1794_v41 }
 0x351   : > { %v1227_v49 = vpop.permute.xlu1 %1226 }
 0x352   : > { %1230 = vst.msk [vmem:[#allocation3 + $0x2] sm:$0x3] %vm1229_vm4, %v1227_v49  ;;  %2309 = vmatpush3.bf16.msra.mxu1 %v2308_v59  ;;  %v2142_v49 = vld [vmem:[%s3632_s18] ss:$0 sm:$0xff]  ;;  %vm1878_vm4 = vcmask 58368  }
 0x353   : > { %1044 = vrot.lane.b32.xlu0 %v1043_v47, %s2823_s11  ;;  %2310 = vmatprep.subr.bf16.mxu1 %v2828_v55  ;;  %v1797_v47 = vld [vmem:[%s3633_s19 + $0x18] sm:$0xff]  ;;  %s3707_s11 = sld [smem:[#allocation48_spill]] }
 0x354   : > { %v2335_v48 = vpack.c.bf16 %v1797_v47, %v1796_v46 }
 0x355   : > { %v1265_v54 = vpop.permute.xlu1 %1264 }
 0x356   : > { %1268 = vst.msk [vmem:[#allocation3 + $0x2] sm:$0x3] %vm1267_vm5, %v1265_v54  ;;  %2312 = vmatpush3.bf16.msra.mxu1 %v2311_v53 }
 0x357   : > { %1163 = vrot.lane.b32.xlu0 %v1162_v50, %s2827_s26  ;;  %2313 = vmatprep.subr.bf16.mxu1 %v2828_v55  ;;  %s880_s26 = scalar_lea.vmem %s3628_s14, %s3174_s27 }
 0x358   : > { %v2139_v32 = vld [vmem:[%s880_s26] ss:$0 sm:$0xff]  ;;  %s3709_s26 = sld [smem:[#allocation49_spill]] }
 0x359   : > { %v2144_v54 = vld [vmem:[%s3707_s11] ss:$0 sm:$0xff] }
 0x35a   : > { %2315 = vmatpush3.bf16.msra.mxu1 %v2314_v5 }
 0x35b   : > { %2316 = vmatprep.subr.bf16.mxu1 %v2828_v55 }
 0x35d   : > { %v1305_v63 = vpop.permute.xlu1 %1304 }
 0x35e   : > { %1308 = vst.msk [vmem:[#allocation3 + $0x2] sm:$0x3] %vm1307_vm6, %v1305_v63  ;;  %2318 = vmatpush3.bf16.msra.mxu1 %v2317_v9  ;;  %v1074_v13 = vpop.permute.xlu0 %1073  ;;  %s892_s23 = scalar_lea.vmem %s3709_s26, %s3708_s12 }
 0x35f   : > { %2319 = vmatprep.subr.bf16.mxu1 %v2828_v55 }
 0x362   : > { %2321 = vmatpush3.bf16.msra.mxu1 %v2320_v23 }
 0x363   : > { %2322 = vmatprep.subr.bf16.mxu1 %v2828_v55 }
 0x365   : > { %v1350_v6 = vpop.permute.xlu1 %1349 }
 0x366   : > { %1353 = vst.msk [vmem:[#allocation3 + $0x2] sm:$0x3] %vm1352_vm7, %v1350_v6  ;;  %2324 = vmatpush3.bf16.msra.mxu1 %v2323_v27 }
 0x367   : > { %2331 = vmatprep.subr.bf16.mxu1 %v2828_v55 }
 0x369   : > { %v1395_v10 = vpop.permute.xlu1 %1394  ;;  %v1103_v60 = vpop.permute.xlu0 %1102 }
 0x36a   : > { %1398 = vst.msk [vmem:[#allocation3 + $0x2] sm:$0x3] %vm1397_vm8, %v1395_v10 }
 0x371   : > { %v1440_v11 = vpop.permute.xlu1 %1439 }
 0x372   : > { %1443 = vst.msk [vmem:[#allocation3 + $0x2] sm:$0x3] %vm1442_vm9, %v1440_v11 }
 0x375   : > { %v1489_v12 = vpop.permute.xlu1 %1488 }
 0x376   : > { %1492 = vst.msk [vmem:[#allocation3 + $0x2] sm:$0x3] %vm1491_vm10, %v1489_v12 }
 0x3b1   : > { %v1133_v15 = vpop.permute.xlu0 %1132 }
 0x3bd   : > { %v1005_v16 = vpop.permute.xlu0 %1004 }
 0x3be   : > { %1008 = vst.msk [vmem:[#allocation3] sm:$0x3] %vm1007_vm11, %v1005_v16 }
 0x3c1   : > { %v1025_v17 = vpop.permute.xlu0 %1024 }
 0x3c2   : > { %1028 = vst.msk [vmem:[#allocation3] sm:$0x3] %vm1027_vm12, %v1025_v17 }
 0x3c5   : > { %v1045_v18 = vpop.permute.xlu0 %1044 }
 0x3c6   : > { %1048 = vst.msk [vmem:[#allocation3] sm:$0x3] %vm1047_vm13, %v1045_v18 }
 0x3c7   : > { %1077 = vst.msk [vmem:[#allocation3] sm:$0x3] %vm1076_vm14, %v1074_v13 }
 0x3c8   : > { %1106 = vst.msk [vmem:[#allocation3] sm:$0x3] %vm1105_vm15, %v1103_v60 }
 0x3c9   : > { %1136 = vst.msk [vmem:[#allocation3] sm:$0x3] %vm1135_vm0, %v1133_v15  ;;  %v1164_v62 = vpop.permute.xlu0 %1163 }
 0x3ca   : > { %1167 = vst.msk [vmem:[#allocation3] sm:$0x3] %vm1166_vm1, %v1164_v62 }
 0x3d1   : > { %v2140_v19 = vld.sshfl [vmem:[#allocation3] sm:$0x33 pattern:$0x76325410] }
 0x3d2   : > { %v1541_v20 = vcombine.high %v2140_v19, %v2140_v19 }
 0x3d4   : > { %1608 = vmatprep.mubr.f32.mxu0 %v1541_v20 }
 0x3d5   : > { %1609 = vmatmul.mubr.f32.vlgmr.msra.gmra.mrb[0].mxu0 %v2140_v19 }
 0x3d6   : > { %2255 = vmatprep.mubr.msk.f32.mxu0 %vm2829_vm2, %v2814_v0  ;;  %2327 = vmatpush3.bf16.msra.mxu0 %v2326_v30 }
 0x3d7   : > { %2328 = vmatprep.subr.bf16.mxu0 %v2828_v55 }
 0x3da   : > { %2330 = vmatpush3.bf16.msra.mxu0 %v2329_v40 }
 0x4a8   : > { %v2182_v31 = vpop.f32.mrb[0].mxu0 }
 0x4a9   : > { %v2183_v34 = vpop.f32.mrb[1].mxu0 }
 0x4aa   : > { %v2184_v35 = vadd.f32 %v2183_v34, %v2182_v31 }
 0x4ac   : > { %v1611_v36 = vadd.f32 %v2184_v35, %v2139_v32 }
 0x4ae   : > { %v1614_v26 = vmax.f32 %v1611_v36, 0.0 }
 0x4b0   : > { %2245 = vmatmul.mubr.f32.vlgmr.msra.gmra.mrb[0].mxu1 %v1614_v26 }
 0x4b1   : > { %2266 = vmatprep.mubr.msk.f32.mxu1 %vm2829_vm2, %v2814_v0  ;;  %2333 = vmatpush3.bf16.msra.mxu1 %v2332_v43  ;;  %v2141_v0 = vld [vmem:[%s888_s10] ss:$0 sm:$0xff] }
 0x4b2   : > { %2334 = vmatprep.subr.bf16.mxu1 %v2828_v55 }
 0x4b5   : > { %2336 = vmatpush3.bf16.msra.mxu1 %v2335_v48 }
 0x583   : > { %v1704_v44 = vpop.f32.mrb[0].mxu1 }
 0x584   : > { %v1705_v45 = vadd.f32 %v2141_v0, %v1704_v44  ;;  %v2246_v38 = vpop.f32.mrb[1].mxu1 }
 0x586   : > { %2256 = vmatmul.mubr.msk.f32.vlgmr.msra.gmra.mrb[2].mxu0 %vm1719_vm3, %v1705_v45 }
 0x659   : > { %v1789_v50 = vpop.f32.mrb[2].mxu0 }
 0x65a   : > { %v1790_v33 = vadd.f32 %v2142_v49, %v1789_v50  ;;  %v2257_v51 = vpop.f32.mrb[3].mxu0 }
 0x65c   : > { %v1793_v52 = vmax.f32 %v1790_v33, 0.0 }
 0x65e   : > { %2267 = vmatmul.mubr.msk.f32.vlgmr.msra.gmra.mrb[2].mxu1 %vm1719_vm3, %v1793_v52 }
 0x731   : > { %v1874_v55 = vpop.f32.mrb[2].mxu1 }
 0x732   : > { %v1875_v56 = vadd.f32 %v2144_v54, %v1874_v55  ;;  %v2268_v57 = vpop.f32.mrb[3].mxu1 }
 0x734   : > { %1879 = vst.msk [vmem:[%s892_s23] sm:$0x3] %vm1878_vm4, %v1875_v56 }
 0x735 PF: > { %s3710_s27 = sld [smem:[#allocation32_spill]]  ;;  %s3711_s2 = sld [smem:[#allocation30_spill]] }
 0x736   : > { %s3712_s25 = sld [smem:[#allocation31_spill]]  ;;  %s3713_s26 = sld [smem:[#allocation33_spill]] }
 0x73b   : > { %p37_p2 = scmp.ge.s32.totalorder %s3710_s27, 4  }
 0x73d   :  { %39 = sbr.rel (!%p37_p2) target bundleno = 26 (0x1a), region = 204 }
 0x744   :  { %1899 = vsyncpa [#allocation5], 1 }
 0x745   :  { %1901 = vsyncpa [#allocation5 + $0x1], 1 }
 0x746   :  { %1902 = vsyncpa [#allocation6], 1 }
 0x747   :  { %1904 = vsyncpa [#allocation6 + $0x1], 1 }
 0x748   :  { %1905 = vsyncpa [#allocation8], 1 }
 0x749   :  { %1906 = vsyncpa [#allocation11], 1 }
 0x74a   :  { %1907 = vsyncpa [#allocation14], 1 }
 0x74b   :  { %1908 = vsyncpa [#allocation17], 1 }
 0x74c   :  { %1909 = vsyncpa [#allocation20], 1 }

</bundles_post_ra>
